<compile_context>
chip_gen: v7x
topology: tpu7x:2x2x1
jax: 0.10.0
libtpu: 0.0.40
codegen_flags: <defaults>
</compile_context>

<pallas_src>
import jax
import jax.numpy as jnp
from jax.experimental import pallas as pl
from jax.experimental.pallas import tpu as pltpu


def _round_up(x, m):
    return (x + m - 1) // m * m


def _tpu_vmem_bytes():
    """Per-core VMEM capacity; conservative (v7x) fallback if query fails."""
    try:
        info = pltpu.get_tpu_info()
        cap = getattr(info, "vmem_capacity_bytes", None)
        if cap:
            return int(cap)
    except Exception:
        pass
    return 64 << 20


def gru_recurrence_kernel(gi_ref, whh_ref, bhhn_ref, out_ref, h_scr):
    """One time-chunk of the GRU recurrence for one batch tile.

    gi_ref  : (TC, Bt, 3*Hp) bf16  precomputed x@W_ih^T + b_ih (+ b_hh r/z),
                                   gate layout r|z|n, each gate Hp lanes.
    whh_ref : (Hp, 3*Hp)     bf16  W_hh^T, gate-padded.
    bhhn_ref: (1, Hp)        f32   n-gate recurrent bias (scaled by r in-kernel).
    out_ref : (TC, Bt, Hp)   f32   hidden-state outputs for this chunk.
    h_scr   : (Bt, Hp)       f32   hidden state carried across time chunks.
    """
    c = pl.program_id(1)              # time-chunk index (sequential axis)
    tc = gi_ref.shape[0]
    bt, hp = h_scr.shape

    @pl.when(c == 0)
    def _():
        h_scr[...] = jnp.zeros_like(h_scr)

    # Constants: loaded once per chunk, hoisted out of the time loop.
    whh_r = whh_ref[:, :hp]                               # bf16 (Hp, Hp)
    whh_z = whh_ref[:, hp:2 * hp]
    whh_n = whh_ref[:, 2 * hp:]
    bhh_n = jnp.broadcast_to(bhhn_ref[...], (bt, hp))     # f32, hoisted broadcast

    def step(i, h):
        gi = gi_ref[i].astype(jnp.float32)                # (Bt, 3*Hp)
        h_bf = h.astype(jnp.bfloat16)
        # Per-gate dots ordered r -> n -> z: EUP (sigmoid/tanh) overlaps the
        # remaining MXU pushes; gate math stays f32.
        gh_r = jnp.dot(h_bf, whh_r, preferred_element_type=jnp.float32)
        r = jax.nn.sigmoid(gi[:, :hp] + gh_r)
        gh_n = jnp.dot(h_bf, whh_n, preferred_element_type=jnp.float32)
        n = jnp.tanh(gi[:, 2 * hp:] + r * (gh_n + bhh_n))
        gh_z = jnp.dot(h_bf, whh_z, preferred_element_type=jnp.float32)
        z = jax.nn.sigmoid(gi[:, hp:2 * hp] + gh_z)
        h_new = n + z * (h - n)                           # == (1-z)*n + z*h
        out_ref[i] = h_new.astype(out_ref.dtype)
        return h_new

    h_scr[...] = jax.lax.fori_loop(0, tc, step, h_scr[...],
                                   unroll=min(4, tc))


def autoregressor_forward(x, w_ih, w_hh, b_ih, b_hh, *, time_chunk=None):
    """GRU forward (batch_first, h0 = 0), matching torch.nn.GRU.

    x    : (B, T, D)
    w_ih : (3H, D)   PyTorch weight_ih_l0 (gate order r, z, n)
    w_hh : (3H, H)
    b_ih : (3H,)
    b_hh : (3H,)
    returns (B, T, H)
    """
    B, T, D = x.shape
    H = w_hh.shape[1]
    f32, bf16 = jnp.float32, jnp.bfloat16

    # ---- TPU-friendly tile sizes -------------------------------------------
    Hp = _round_up(H, 128)            # each gate 128-lane aligned
    Bp = _round_up(B, 8)              # sublane-aligned batch
    Bt = min(Bp, 128)                 # batch tile (parallel / megacore axis)
    if Bp >= 16 and Bp // Bt < 2:     # give v7x's 2 TensorCores >= 2 tiles
        Bt = _round_up((Bp + 1) // 2, 8)
    Bp = _round_up(Bp, Bt)

    # ---- VMEM-budget-aware time chunking -----------------------------------
    cap = _tpu_vmem_bytes()
    budget = int(cap * 0.75)
    per_t = Bt * Hp * (2 * 3 * 2 + 2 * 4)        # dbl-buffered bf16 gi + f32 out
    fixed = Hp * 3 * Hp * 2 * 2 + Bt * Hp * 4 + 4 * Hp
    tc = int(max(1, min(T, (budget - fixed) // max(per_t, 1))))
    if time_chunk is not None:
        tc = max(1, min(tc, int(time_chunk)))
    Tp = _round_up(T, tc)             # pad T instead of shrinking tc

    vmem_limit = per_t * tc + fixed + (8 << 20)
    vmem_limit = max(vmem_limit, 32 << 20)
    vmem_limit = min(vmem_limit, cap - (4 << 20))
    vmem_limit = int(max(vmem_limit, 16 << 20))

    # ---- Hoisted input projection (bf16 MXU, f32 accumulation) -------------
    # Time-major x first: moves a D-wide tensor instead of a 3H-wide gi.
    xt = jnp.transpose(x, (1, 0, 2)).astype(bf16)            # (T, B, D)
    wih_t = w_ih.astype(bf16).T                              # (D, 3H)
    # Fold b_ih and the r/z parts of b_hh into gi; only the n-gate recurrent
    # bias must stay inside the kernel (it is multiplied by r).
    bias = b_ih.astype(f32) + jnp.concatenate(
        [b_hh[:H].astype(f32), b_hh[H:2 * H].astype(f32), jnp.zeros((H,), f32)])
    gi = jnp.dot(xt.reshape(T * B, D), wih_t,
                 preferred_element_type=f32) + bias          # (T*B, 3H) f32
    gi = gi.astype(bf16).reshape(T, B, 3, H)
    gi = jnp.pad(gi, ((0, Tp - T), (0, Bp - B), (0, 0), (0, Hp - H)))
    gi = gi.reshape(Tp, Bp, 3 * Hp)                          # time-major, gate-aligned

    whh = w_hh.astype(f32).T.reshape(H, 3, H)                # (H, 3, H)
    whh = jnp.pad(whh, ((0, Hp - H), (0, 0), (0, Hp - H)))
    whh = whh.reshape(Hp, 3 * Hp).astype(bf16)
    bhhn = jnp.pad(b_hh[2 * H:].astype(f32), (0, Hp - H)).reshape(1, Hp)

    # ---- Pallas call --------------------------------------------------------
    def _build(single_buffer_consts):
        const_kw = ({"pipeline_mode": pl.Buffered(1)}
                    if single_buffer_consts else {})
        return pl.pallas_call(
            gru_recurrence_kernel,
            out_shape=jax.ShapeDtypeStruct((Tp, Bp, Hp), f32),
            grid_spec=pltpu.PrefetchScalarGridSpec(
                num_scalar_prefetch=0,
                grid=(Bp // Bt, Tp // tc),          # (batch tiles, time chunks)
                in_specs=[
                    pl.BlockSpec((tc, Bt, 3 * Hp), lambda b, c: (c, b, 0)),
                    pl.BlockSpec((Hp, 3 * Hp), lambda b, c: (0, 0), **const_kw),
                    pl.BlockSpec((1, Hp), lambda b, c: (0, 0), **const_kw),
                ],
                out_specs=pl.BlockSpec((tc, Bt, Hp), lambda b, c: (c, b, 0)),
                scratch_shapes=[pltpu.VMEM((Bt, Hp), jnp.float32)],
            ),
            compiler_params=pltpu.CompilerParams(
                dimension_semantics=("parallel", "arbitrary"),
                vmem_limit_bytes=vmem_limit),
        )

    if hasattr(pl, "Buffered"):
        try:
            out_tm = _build(True)(gi, whh, bhhn)
        except Exception:       # fall back if single-buffering is unsupported
            out_tm = _build(False)(gi, whh, bhhn)
    else:
        out_tm = _build(False)(gi, whh, bhhn)

    # Final layout back to batch_first; done outside the kernel to keep the
    # per-step store lane-dense (time-major in-kernel).
    return out_tm[:T, :B, :H].transpose(1, 0, 2).astype(x.dtype)


def gru_reference(x, w_ih, w_hh, b_ih, b_hh):
    """Pure-JAX f32 reference matching torch.nn.GRU (batch_first, h0 = 0)."""
    B, T, D = x.shape
    H = w_hh.shape[1]

    def step(h, x_t):
        gi = x_t @ w_ih.T + b_ih
        gh = h @ w_hh.T + b_hh
        i_r, i_z, i_n = gi[:, :H], gi[:, H:2 * H], gi[:, 2 * H:]
        h_r, h_z, h_n = gh[:, :H], gh[:, H:2 * H], gh[:, 2 * H:]
        r = jax.nn.sigmoid(i_r + h_r)
        z = jax.nn.sigmoid(i_z + h_z)
        n = jnp.tanh(i_n + r * h_n)
        h_new = (1.0 - z) * n + z * h
        return h_new, h_new

    h0 = jnp.zeros((B, H), jnp.float32)
    _, ys = jax.lax.scan(step, h0, jnp.transpose(x, (1, 0, 2)))
    return jnp.transpose(ys, (1, 0, 2))


if __name__ == "__main__":
    # Small shapes implied by the module: input (B, T, input_size) -> (B, T, hidden_dim)
    B, T, INPUT_SIZE, HIDDEN = 4, 8, 16, 32

    key = jax.random.PRNGKey(0)
    kx, k1, k2, k3, k4 = jax.random.split(key, 5)

    # Deterministic parameter init (mimics PyTorch uniform(-1/sqrt(H), 1/sqrt(H)))
    bound = 1.0 / (HIDDEN ** 0.5)
    w_ih = jax.random.uniform(k1, (3 * HIDDEN, INPUT_SIZE), jnp.float32, -bound, bound)
    w_hh = jax.random.uniform(k2, (3 * HIDDEN, HIDDEN), jnp.float32, -bound, bound)
    b_ih = jax.random.uniform(k3, (3 * HIDDEN,), jnp.float32, -bound, bound)
    b_hh = jax.random.uniform(k4, (3 * HIDDEN,), jnp.float32, -bound, bound)

    x = jax.random.normal(kx, (B, T, INPUT_SIZE), jnp.float32)

    # time_chunk=4 -> 2 time chunks, exercising the carried hidden state across
    # grid steps (default is budget-driven tc = T for this small problem).
    out = autoregressor_forward(x, w_ih, w_hh, b_ih, b_hh, time_chunk=4)
    out = jax.block_until_ready(out)

    ref = jax.block_until_ready(gru_reference(x, w_ih, w_hh, b_ih, b_hh))
    assert out.shape == (B, T, HIDDEN)
    # bf16 matmul operands / bf16-streamed gi -> looser tolerance vs f32 reference.
    assert jnp.allclose(out, ref, atol=2e-2, rtol=2e-2), "Pallas GRU mismatch vs reference"

    print("KERNEL_OK")
</pallas_src>

<mosaic_0001>
module attributes {stable_mosaic.version = 11 : i64} {
  func.func @gru_recurrence_kernel(%arg0: i32, %arg1: i32, %arg2: memref<4x8x384xbf16, #tpu.memory_space<vmem>>, %arg3: memref<128x384xbf16, #tpu.memory_space<vmem>>, %arg4: memref<1x128xf32, #tpu.memory_space<vmem>>, %arg5: memref<4x8x128xf32, #tpu.memory_space<vmem>>, %arg6: memref<8x128xf32, #tpu.memory_space<vmem>>) attributes {dimension_semantics = [#tpu.dimension_semantics<parallel>, #tpu.dimension_semantics<arbitrary>], iteration_bounds = array<i64: 1, 2>, scalar_prefetch = 0 : i64, scratch_operands = 1 : i64, tpu.core_type = #tpu.core_type<tc>, window_params = [{transform_indices = @transform_0, window_bounds = array<i64: 4, 8, 384>}, {pipeline_mode = #tpu.pipeline_mode<synchronous>, transform_indices = @transform_1, window_bounds = array<i64: 128, 384>}, {pipeline_mode = #tpu.pipeline_mode<synchronous>, transform_indices = @transform_2, window_bounds = array<i64: 1, 128>}, {transform_indices = @transform_3, window_bounds = array<i64: 4, 8, 128>}]} {
    %c0_i32 = arith.constant 0 : i32
    %0 = arith.cmpi eq, %arg1, %c0_i32 : i32
    %1 = arith.extui %0 : i1 to i32
    %c0_i32_0 = arith.constant 0 : i32
    %2 = arith.cmpi ne, %1, %c0_i32_0 : i32
    scf.if %2 {
      %cst_46 = arith.constant 0.000000e+00 : f32
      %147 = vector.broadcast %cst_46 : f32 to vector<8x128xf32>
      %c0_47 = arith.constant 0 : index
      %c0_48 = arith.constant 0 : index
      %148 = vector.load %arg6[%c0_47, %c0_48] : memref<8x128xf32, #tpu.memory_space<vmem>>, vector<8x128xf32>
      tpu.vector_store %arg6[%c0_47, %c0_48], %147 {strides = array<i32>} : memref<8x128xf32, #tpu.memory_space<vmem>>, vector<8x128xf32>,
    } else {
    }
    %c0 = arith.constant 0 : index
    %c0_1 = arith.constant 0 : index
    %3 = vector.load %arg3[%c0, %c0_1] : memref<128x384xbf16, #tpu.memory_space<vmem>>, vector<128x128xbf16>
    %c0_2 = arith.constant 0 : index
    %c128 = arith.constant 128 : index
    %4 = vector.load %arg3[%c0_2, %c128] : memref<128x384xbf16, #tpu.memory_space<vmem>>, vector<128x128xbf16>
    %c0_3 = arith.constant 0 : index
    %c256 = arith.constant 256 : index
    %5 = vector.load %arg3[%c0_3, %c256] : memref<128x384xbf16, #tpu.memory_space<vmem>>, vector<128x128xbf16>
    %c0_4 = arith.constant 0 : index
    %c0_5 = arith.constant 0 : index
    %6 = vector.load %arg4[%c0_4, %c0_5] : memref<1x128xf32, #tpu.memory_space<vmem>>, vector<1x128xf32>
    %7 = vector.shape_cast %6 : vector<1x128xf32> to vector<1x128xf32>
    %8 = vector.broadcast %7 : vector<1x128xf32> to vector<8x128xf32>
    %c0_6 = arith.constant 0 : index
    %c0_7 = arith.constant 0 : index
    %9 = vector.load %arg6[%c0_6, %c0_7] : memref<8x128xf32, #tpu.memory_space<vmem>>, vector<8x128xf32>
    %c0_i32_8 = arith.constant 0 : i32
    %10 = arith.index_cast %c0_i32_8 : i32 to index
    %c0_9 = arith.constant 0 : index
    %c0_10 = arith.constant 0 : index
    %11 = vector.load %arg2[%10, %c0_9, %c0_10] : memref<4x8x384xbf16, #tpu.memory_space<vmem>>, vector<1x8x384xbf16>
    %12 = vector.shape_cast %11 : vector<1x8x384xbf16> to vector<8x384xbf16>
    %13 = arith.extf %12 : vector<8x384xbf16> to vector<8x384xf32>
    %14 = arith.truncf %9 : vector<8x128xf32> to vector<8x128xbf16>
    %cst = arith.constant dense<0.000000e+00> : vector<8x128xf32>
    %15 = tpu.matmul %14, %3, %cst {dimension_numbers = #tpu.dot_dimension_numbers<[1], [0], [0], [1], [0, 0, 1, 1], [], []>} : vector<8x128xbf16>, vector<128x128xbf16>, vector<8x128xf32> -> vector<8x128xf32>
    %16 = vector.extract_strided_slice %13 {offsets = [0, 0], sizes = [8, 128], strides = [1, 1]} : vector<8x384xf32> to vector<8x128xf32>
    %17 = arith.addf %16, %15 : vector<8x128xf32>
    %18 = arith.negf %17 : vector<8x128xf32>
    %19 = math.exp %18 : vector<8x128xf32>
    %cst_11 = arith.constant 1.000000e+00 : f32
    %20 = vector.broadcast %cst_11 : f32 to vector<8x128xf32>
    %21 = arith.addf %20, %19 : vector<8x128xf32>
    %22 = arith.divf %20, %21 : vector<8x128xf32>
    %cst_12 = arith.constant dense<0.000000e+00> : vector<8x128xf32>
    %23 = tpu.matmul %14, %5, %cst_12 {dimension_numbers = #tpu.dot_dimension_numbers<[1], [0], [0], [1], [0, 0, 1, 1], [], []>} : vector<8x128xbf16>, vector<128x128xbf16>, vector<8x128xf32> -> vector<8x128xf32>
    %24 = vector.extract_strided_slice %13 {offsets = [0, 256], sizes = [8, 128], strides = [1, 1]} : vector<8x384xf32> to vector<8x128xf32>
    %25 = arith.addf %23, %8 : vector<8x128xf32>
    %26 = arith.mulf %22, %25 : vector<8x128xf32>
    %27 = arith.addf %24, %26 : vector<8x128xf32>
    %28 = math.tanh %27 : vector<8x128xf32>
    %cst_13 = arith.constant dense<0.000000e+00> : vector<8x128xf32>
    %29 = tpu.matmul %14, %4, %cst_13 {dimension_numbers = #tpu.dot_dimension_numbers<[1], [0], [0], [1], [0, 0, 1, 1], [], []>} : vector<8x128xbf16>, vector<128x128xbf16>, vector<8x128xf32> -> vector<8x128xf32>
    %30 = vector.extract_strided_slice %13 {offsets = [0, 128], sizes = [8, 128], strides = [1, 1]} : vector<8x384xf32> to vector<8x128xf32>
    %31 = arith.addf %30, %29 : vector<8x128xf32>
    %32 = arith.negf %31 : vector<8x128xf32>
    %33 = math.exp %32 : vector<8x128xf32>
    %cst_14 = arith.constant 1.000000e+00 : f32
    %34 = vector.broadcast %cst_14 : f32 to vector<8x128xf32>
    %35 = arith.addf %34, %33 : vector<8x128xf32>
    %36 = arith.divf %34, %35 : vector<8x128xf32>
    %37 = arith.subf %9, %28 : vector<8x128xf32>
    %38 = arith.mulf %36, %37 : vector<8x128xf32>
    %39 = arith.addf %28, %38 : vector<8x128xf32>
    %40 = arith.index_cast %c0_i32_8 : i32 to index
    %c0_15 = arith.constant 0 : index
    %c0_16 = arith.constant 0 : index
    %41 = vector.load %arg5[%40, %c0_15, %c0_16] : memref<4x8x128xf32, #tpu.memory_space<vmem>>, vector<1x8x128xf32>
    %42 = vector.shape_cast %41 : vector<1x8x128xf32> to vector<8x128xf32>
    %43 = vector.shape_cast %39 : vector<8x128xf32> to vector<1x8x128xf32>
    tpu.vector_store %arg5[%40, %c0_15, %c0_16], %43 {strides = array<i32>} : memref<4x8x128xf32, #tpu.memory_space<vmem>>, vector<1x8x128xf32>,
    %c1_i32 = arith.constant 1 : i32
    %44 = arith.index_cast %c1_i32 : i32 to index
    %c0_17 = arith.constant 0 : index
    %c0_18 = arith.constant 0 : index
    %45 = vector.load %arg2[%44, %c0_17, %c0_18] : memref<4x8x384xbf16, #tpu.memory_space<vmem>>, vector<1x8x384xbf16>
    %46 = vector.shape_cast %45 : vector<1x8x384xbf16> to vector<8x384xbf16>
    %47 = arith.extf %46 : vector<8x384xbf16> to vector<8x384xf32>
    %48 = arith.truncf %39 : vector<8x128xf32> to vector<8x128xbf16>
    %cst_19 = arith.constant dense<0.000000e+00> : vector<8x128xf32>
    %49 = tpu.matmul %48, %3, %cst_19 {dimension_numbers = #tpu.dot_dimension_numbers<[1], [0], [0], [1], [0, 0, 1, 1], [], []>} : vector<8x128xbf16>, vector<128x128xbf16>, vector<8x128xf32> -> vector<8x128xf32>
    %50 = vector.extract_strided_slice %47 {offsets = [0, 0], sizes = [8, 128], strides = [1, 1]} : vector<8x384xf32> to vector<8x128xf32>
    %51 = arith.addf %50, %49 : vector<8x128xf32>
    %52 = arith.negf %51 : vector<8x128xf32>
    %53 = math.exp %52 : vector<8x128xf32>
    %cst_20 = arith.constant 1.000000e+00 : f32
    %54 = vector.broadcast %cst_20 : f32 to vector<8x128xf32>
    %55 = arith.addf %54, %53 : vector<8x128xf32>
    %56 = arith.divf %54, %55 : vector<8x128xf32>
    %cst_21 = arith.constant dense<0.000000e+00> : vector<8x128xf32>
    %57 = tpu.matmul %48, %5, %cst_21 {dimension_numbers = #tpu.dot_dimension_numbers<[1], [0], [0], [1], [0, 0, 1, 1], [], []>} : vector<8x128xbf16>, vector<128x128xbf16>, vector<8x128xf32> -> vector<8x128xf32>
    %58 = vector.extract_strided_slice %47 {offsets = [0, 256], sizes = [8, 128], strides = [1, 1]} : vector<8x384xf32> to vector<8x128xf32>
    %59 = arith.addf %57, %8 : vector<8x128xf32>
    %60 = arith.mulf %56, %59 : vector<8x128xf32>
    %61 = arith.addf %58, %60 : vector<8x128xf32>
    %62 = math.tanh %61 : vector<8x128xf32>
    %cst_22 = arith.constant dense<0.000000e+00> : vector<8x128xf32>
    %63 = tpu.matmul %48, %4, %cst_22 {dimension_numbers = #tpu.dot_dimension_numbers<[1], [0], [0], [1], [0, 0, 1, 1], [], []>} : vector<8x128xbf16>, vector<128x128xbf16>, vector<8x128xf32> -> vector<8x128xf32>
    %64 = vector.extract_strided_slice %47 {offsets = [0, 128], sizes = [8, 128], strides = [1, 1]} : vector<8x384xf32> to vector<8x128xf32>
    %65 = arith.addf %64, %63 : vector<8x128xf32>
    %66 = arith.negf %65 : vector<8x128xf32>
    %67 = math.exp %66 : vector<8x128xf32>
    %cst_23 = arith.constant 1.000000e+00 : f32
    %68 = vector.broadcast %cst_23 : f32 to vector<8x128xf32>
    %69 = arith.addf %68, %67 : vector<8x128xf32>
    %70 = arith.divf %68, %69 : vector<8x128xf32>
    %71 = arith.subf %39, %62 : vector<8x128xf32>
    %72 = arith.mulf %70, %71 : vector<8x128xf32>
    %73 = arith.addf %62, %72 : vector<8x128xf32>
    %74 = arith.index_cast %c1_i32 : i32 to index
    %c0_24 = arith.constant 0 : index
    %c0_25 = arith.constant 0 : index
    %75 = vector.load %arg5[%74, %c0_24, %c0_25] : memref<4x8x128xf32, #tpu.memory_space<vmem>>, vector<1x8x128xf32>
    %76 = vector.shape_cast %75 : vector<1x8x128xf32> to vector<8x128xf32>
    %77 = vector.shape_cast %73 : vector<8x128xf32> to vector<1x8x128xf32>
    tpu.vector_store %arg5[%74, %c0_24, %c0_25], %77 {strides = array<i32>} : memref<4x8x128xf32, #tpu.memory_space<vmem>>, vector<1x8x128xf32>,
    %c2_i32 = arith.constant 2 : i32
    %78 = arith.index_cast %c2_i32 : i32 to index
    %c0_26 = arith.constant 0 : index
    %c0_27 = arith.constant 0 : index
    %79 = vector.load %arg2[%78, %c0_26, %c0_27] : memref<4x8x384xbf16, #tpu.memory_space<vmem>>, vector<1x8x384xbf16>
    %80 = vector.shape_cast %79 : vector<1x8x384xbf16> to vector<8x384xbf16>
    %81 = arith.extf %80 : vector<8x384xbf16> to vector<8x384xf32>
    %82 = arith.truncf %73 : vector<8x128xf32> to vector<8x128xbf16>
    %cst_28 = arith.constant dense<0.000000e+00> : vector<8x128xf32>
    %83 = tpu.matmul %82, %3, %cst_28 {dimension_numbers = #tpu.dot_dimension_numbers<[1], [0], [0], [1], [0, 0, 1, 1], [], []>} : vector<8x128xbf16>, vector<128x128xbf16>, vector<8x128xf32> -> vector<8x128xf32>
    %84 = vector.extract_strided_slice %81 {offsets = [0, 0], sizes = [8, 128], strides = [1, 1]} : vector<8x384xf32> to vector<8x128xf32>
    %85 = arith.addf %84, %83 : vector<8x128xf32>
    %86 = arith.negf %85 : vector<8x128xf32>
    %87 = math.exp %86 : vector<8x128xf32>
    %cst_29 = arith.constant 1.000000e+00 : f32
    %88 = vector.broadcast %cst_29 : f32 to vector<8x128xf32>
    %89 = arith.addf %88, %87 : vector<8x128xf32>
    %90 = arith.divf %88, %89 : vector<8x128xf32>
    %cst_30 = arith.constant dense<0.000000e+00> : vector<8x128xf32>
    %91 = tpu.matmul %82, %5, %cst_30 {dimension_numbers = #tpu.dot_dimension_numbers<[1], [0], [0], [1], [0, 0, 1, 1], [], []>} : vector<8x128xbf16>, vector<128x128xbf16>, vector<8x128xf32> -> vector<8x128xf32>
    %92 = vector.extract_strided_slice %81 {offsets = [0, 256], sizes = [8, 128], strides = [1, 1]} : vector<8x384xf32> to vector<8x128xf32>
    %93 = arith.addf %91, %8 : vector<8x128xf32>
    %94 = arith.mulf %90, %93 : vector<8x128xf32>
    %95 = arith.addf %92, %94 : vector<8x128xf32>
    %96 = math.tanh %95 : vector<8x128xf32>
    %cst_31 = arith.constant dense<0.000000e+00> : vector<8x128xf32>
    %97 = tpu.matmul %82, %4, %cst_31 {dimension_numbers = #tpu.dot_dimension_numbers<[1], [0], [0], [1], [0, 0, 1, 1], [], []>} : vector<8x128xbf16>, vector<128x128xbf16>, vector<8x128xf32> -> vector<8x128xf32>
    %98 = vector.extract_strided_slice %81 {offsets = [0, 128], sizes = [8, 128], strides = [1, 1]} : vector<8x384xf32> to vector<8x128xf32>
    %99 = arith.addf %98, %97 : vector<8x128xf32>
    %100 = arith.negf %99 : vector<8x128xf32>
    %101 = math.exp %100 : vector<8x128xf32>
    %cst_32 = arith.constant 1.000000e+00 : f32
    %102 = vector.broadcast %cst_32 : f32 to vector<8x128xf32>
    %103 = arith.addf %102, %101 : vector<8x128xf32>
    %104 = arith.divf %102, %103 : vector<8x128xf32>
    %105 = arith.subf %73, %96 : vector<8x128xf32>
    %106 = arith.mulf %104, %105 : vector<8x128xf32>
    %107 = arith.addf %96, %106 : vector<8x128xf32>
    %108 = arith.index_cast %c2_i32 : i32 to index
    %c0_33 = arith.constant 0 : index
    %c0_34 = arith.constant 0 : index
    %109 = vector.load %arg5[%108, %c0_33, %c0_34] : memref<4x8x128xf32, #tpu.memory_space<vmem>>, vector<1x8x128xf32>
    %110 = vector.shape_cast %109 : vector<1x8x128xf32> to vector<8x128xf32>
    %111 = vector.shape_cast %107 : vector<8x128xf32> to vector<1x8x128xf32>
    tpu.vector_store %arg5[%108, %c0_33, %c0_34], %111 {strides = array<i32>} : memref<4x8x128xf32, #tpu.memory_space<vmem>>, vector<1x8x128xf32>,
    %c3_i32 = arith.constant 3 : i32
    %112 = arith.index_cast %c3_i32 : i32 to index
    %c0_35 = arith.constant 0 : index
    %c0_36 = arith.constant 0 : index
    %113 = vector.load %arg2[%112, %c0_35, %c0_36] : memref<4x8x384xbf16, #tpu.memory_space<vmem>>, vector<1x8x384xbf16>
    %114 = vector.shape_cast %113 : vector<1x8x384xbf16> to vector<8x384xbf16>
    %115 = arith.extf %114 : vector<8x384xbf16> to vector<8x384xf32>
    %116 = arith.truncf %107 : vector<8x128xf32> to vector<8x128xbf16>
    %cst_37 = arith.constant dense<0.000000e+00> : vector<8x128xf32>
    %117 = tpu.matmul %116, %3, %cst_37 {dimension_numbers = #tpu.dot_dimension_numbers<[1], [0], [0], [1], [0, 0, 1, 1], [], []>} : vector<8x128xbf16>, vector<128x128xbf16>, vector<8x128xf32> -> vector<8x128xf32>
    %118 = vector.extract_strided_slice %115 {offsets = [0, 0], sizes = [8, 128], strides = [1, 1]} : vector<8x384xf32> to vector<8x128xf32>
    %119 = arith.addf %118, %117 : vector<8x128xf32>
    %120 = arith.negf %119 : vector<8x128xf32>
    %121 = math.exp %120 : vector<8x128xf32>
    %cst_38 = arith.constant 1.000000e+00 : f32
    %122 = vector.broadcast %cst_38 : f32 to vector<8x128xf32>
    %123 = arith.addf %122, %121 : vector<8x128xf32>
    %124 = arith.divf %122, %123 : vector<8x128xf32>
    %cst_39 = arith.constant dense<0.000000e+00> : vector<8x128xf32>
    %125 = tpu.matmul %116, %5, %cst_39 {dimension_numbers = #tpu.dot_dimension_numbers<[1], [0], [0], [1], [0, 0, 1, 1], [], []>} : vector<8x128xbf16>, vector<128x128xbf16>, vector<8x128xf32> -> vector<8x128xf32>
    %126 = vector.extract_strided_slice %115 {offsets = [0, 256], sizes = [8, 128], strides = [1, 1]} : vector<8x384xf32> to vector<8x128xf32>
    %127 = arith.addf %125, %8 : vector<8x128xf32>
    %128 = arith.mulf %124, %127 : vector<8x128xf32>
    %129 = arith.addf %126, %128 : vector<8x128xf32>
    %130 = math.tanh %129 : vector<8x128xf32>
    %cst_40 = arith.constant dense<0.000000e+00> : vector<8x128xf32>
    %131 = tpu.matmul %116, %4, %cst_40 {dimension_numbers = #tpu.dot_dimension_numbers<[1], [0], [0], [1], [0, 0, 1, 1], [], []>} : vector<8x128xbf16>, vector<128x128xbf16>, vector<8x128xf32> -> vector<8x128xf32>
    %132 = vector.extract_strided_slice %115 {offsets = [0, 128], sizes = [8, 128], strides = [1, 1]} : vector<8x384xf32> to vector<8x128xf32>
    %133 = arith.addf %132, %131 : vector<8x128xf32>
    %134 = arith.negf %133 : vector<8x128xf32>
    %135 = math.exp %134 : vector<8x128xf32>
    %cst_41 = arith.constant 1.000000e+00 : f32
    %136 = vector.broadcast %cst_41 : f32 to vector<8x128xf32>
    %137 = arith.addf %136, %135 : vector<8x128xf32>
    %138 = arith.divf %136, %137 : vector<8x128xf32>
    %139 = arith.subf %107, %130 : vector<8x128xf32>
    %140 = arith.mulf %138, %139 : vector<8x128xf32>
    %141 = arith.addf %130, %140 : vector<8x128xf32>
    %142 = arith.index_cast %c3_i32 : i32 to index
    %c0_42 = arith.constant 0 : index
    %c0_43 = arith.constant 0 : index
    %143 = vector.load %arg5[%142, %c0_42, %c0_43] : memref<4x8x128xf32, #tpu.memory_space<vmem>>, vector<1x8x128xf32>
    %144 = vector.shape_cast %143 : vector<1x8x128xf32> to vector<8x128xf32>
    %145 = vector.shape_cast %141 : vector<8x128xf32> to vector<1x8x128xf32>
    tpu.vector_store %arg5[%142, %c0_42, %c0_43], %145 {strides = array<i32>} : memref<4x8x128xf32, #tpu.memory_space<vmem>>, vector<1x8x128xf32>,
    %c4_i32 = arith.constant 4 : i32
    %c0_44 = arith.constant 0 : index
    %c0_45 = arith.constant 0 : index
    %146 = vector.load %arg6[%c0_44, %c0_45] : memref<8x128xf32, #tpu.memory_space<vmem>>, vector<8x128xf32>
    tpu.vector_store %arg6[%c0_44, %c0_45], %141 {strides = array<i32>} : memref<8x128xf32, #tpu.memory_space<vmem>>, vector<8x128xf32>,
    return
  }
  func.func @transform_0(%arg0: i32, %arg1: i32) -> (i32, i32, i32) {
    %c0_i32 = arith.constant 0 : i32
    %c0_i32_0 = arith.constant 0 : i32
    return %arg1, %arg0, %c0_i32 : i32, i32, i32
  }
  func.func @transform_1(%arg0: i32, %arg1: i32) -> (i32, i32) {
    %c0_i32 = arith.constant 0 : i32
    %c0_i32_0 = arith.constant 0 : i32
    %c0_i32_1 = arith.constant 0 : i32
    return %c0_i32, %c0_i32_0 : i32, i32
  }
  func.func @transform_2(%arg0: i32, %arg1: i32) -> (i32, i32) {
    %c0_i32 = arith.constant 0 : i32
    %c0_i32_0 = arith.constant 0 : i32
    %c0_i32_1 = arith.constant 0 : i32
    return %c0_i32, %c0_i32_0 : i32, i32
  }
  func.func @transform_3(%arg0: i32, %arg1: i32) -> (i32, i32, i32) {
    %c0_i32 = arith.constant 0 : i32
    %c0_i32_0 = arith.constant 0 : i32
    return %arg1, %arg0, %c0_i32 : i32, i32, i32
  }
}

module attributes {stable_mosaic.version = 11 : i64} {
  func.func @gru_recurrence_kernel(%arg0: i32, %arg1: i32, %arg2: memref<4x8x384xbf16, #tpu.memory_space<vmem>>, %arg3: memref<128x384xbf16, #tpu.memory_space<vmem>>, %arg4: memref<1x128xf32, #tpu.memory_space<vmem>>, %arg5: memref<4x8x128xf32, #tpu.memory_space<vmem>>, %arg6: memref<8x128xf32, #tpu.memory_space<vmem>>) attributes {dimension_semantics = [#tpu.dimension_semantics<parallel>, #tpu.dimension_semantics<arbitrary>], iteration_bounds = array<i64: 1, 2>, scalar_prefetch = 0 : i64, scratch_operands = 1 : i64, tpu.core_type = #tpu.core_type<tc>, window_params = [{transform_indices = @transform_0, window_bounds = array<i64: 4, 8, 384>}, {pipeline_mode = #tpu.pipeline_mode<synchronous>, transform_indices = @transform_1, window_bounds = array<i64: 128, 384>}, {pipeline_mode = #tpu.pipeline_mode<synchronous>, transform_indices = @transform_2, window_bounds = array<i64: 1, 128>}, {transform_indices = @transform_3, window_bounds = array<i64: 4, 8, 128>}]} {
    %c0_i32 = arith.constant 0 : i32
    %0 = arith.cmpi eq, %arg1, %c0_i32 : i32
    %1 = arith.extui %0 : i1 to i32
    %c0_i32_0 = arith.constant 0 : i32
    %2 = arith.cmpi ne, %1, %c0_i32_0 : i32
    scf.if %2 {
      %cst_46 = arith.constant 0.000000e+00 : f32
      %147 = vector.broadcast %cst_46 : f32 to vector<8x128xf32>
      %c0_47 = arith.constant 0 : index
      %c0_48 = arith.constant 0 : index
      %148 = vector.load %arg6[%c0_47, %c0_48] : memref<8x128xf32, #tpu.memory_space<vmem>>, vector<8x128xf32>
      tpu.vector_store %arg6[%c0_47, %c0_48], %147 {strides = array<i32>} : memref<8x128xf32, #tpu.memory_space<vmem>>, vector<8x128xf32>,
    } else {
    }
    %c0 = arith.constant 0 : index
    %c0_1 = arith.constant 0 : index
    %3 = vector.load %arg3[%c0, %c0_1] : memref<128x384xbf16, #tpu.memory_space<vmem>>, vector<128x128xbf16>
    %c0_2 = arith.constant 0 : index
    %c128 = arith.constant 128 : index
    %4 = vector.load %arg3[%c0_2, %c128] : memref<128x384xbf16, #tpu.memory_space<vmem>>, vector<128x128xbf16>
    %c0_3 = arith.constant 0 : index
    %c256 = arith.constant 256 : index
    %5 = vector.load %arg3[%c0_3, %c256] : memref<128x384xbf16, #tpu.memory_space<vmem>>, vector<128x128xbf16>
    %c0_4 = arith.constant 0 : index
    %c0_5 = arith.constant 0 : index
    %6 = vector.load %arg4[%c0_4, %c0_5] : memref<1x128xf32, #tpu.memory_space<vmem>>, vector<1x128xf32>
    %7 = vector.shape_cast %6 : vector<1x128xf32> to vector<1x128xf32>
    %8 = vector.broadcast %7 : vector<1x128xf32> to vector<8x128xf32>
    %c0_6 = arith.constant 0 : index
    %c0_7 = arith.constant 0 : index
    %9 = vector.load %arg6[%c0_6, %c0_7] : memref<8x128xf32, #tpu.memory_space<vmem>>, vector<8x128xf32>
    %c0_i32_8 = arith.constant 0 : i32
    %10 = arith.index_cast %c0_i32_8 : i32 to index
    %c0_9 = arith.constant 0 : index
    %c0_10 = arith.constant 0 : index
    %11 = vector.load %arg2[%10, %c0_9, %c0_10] : memref<4x8x384xbf16, #tpu.memory_space<vmem>>, vector<1x8x384xbf16>
    %12 = vector.shape_cast %11 : vector<1x8x384xbf16> to vector<8x384xbf16>
    %13 = arith.extf %12 : vector<8x384xbf16> to vector<8x384xf32>
    %14 = arith.truncf %9 : vector<8x128xf32> to vector<8x128xbf16>
    %cst = arith.constant dense<0.000000e+00> : vector<8x128xf32>
    %15 = tpu.matmul %14, %3, %cst {dimension_numbers = #tpu.dot_dimension_numbers<[1], [0], [0], [1], [0, 0, 1, 1], [], []>} : vector<8x128xbf16>, vector<128x128xbf16>, vector<8x128xf32> -> vector<8x128xf32>
    %16 = vector.extract_strided_slice %13 {offsets = [0, 0], sizes = [8, 128], strides = [1, 1]} : vector<8x384xf32> to vector<8x128xf32>
    %17 = arith.addf %16, %15 : vector<8x128xf32>
    %18 = arith.negf %17 : vector<8x128xf32>
    %19 = math.exp %18 : vector<8x128xf32>
    %cst_11 = arith.constant 1.000000e+00 : f32
    %20 = vector.broadcast %cst_11 : f32 to vector<8x128xf32>
    %21 = arith.addf %20, %19 : vector<8x128xf32>
    %22 = arith.divf %20, %21 : vector<8x128xf32>
    %cst_12 = arith.constant dense<0.000000e+00> : vector<8x128xf32>
    %23 = tpu.matmul %14, %5, %cst_12 {dimension_numbers = #tpu.dot_dimension_numbers<[1], [0], [0], [1], [0, 0, 1, 1], [], []>} : vector<8x128xbf16>, vector<128x128xbf16>, vector<8x128xf32> -> vector<8x128xf32>
    %24 = vector.extract_strided_slice %13 {offsets = [0, 256], sizes = [8, 128], strides = [1, 1]} : vector<8x384xf32> to vector<8x128xf32>
    %25 = arith.addf %23, %8 : vector<8x128xf32>
    %26 = arith.mulf %22, %25 : vector<8x128xf32>
    %27 = arith.addf %24, %26 : vector<8x128xf32>
    %28 = math.tanh %27 : vector<8x128xf32>
    %cst_13 = arith.constant dense<0.000000e+00> : vector<8x128xf32>
    %29 = tpu.matmul %14, %4, %cst_13 {dimension_numbers = #tpu.dot_dimension_numbers<[1], [0], [0], [1], [0, 0, 1, 1], [], []>} : vector<8x128xbf16>, vector<128x128xbf16>, vector<8x128xf32> -> vector<8x128xf32>
    %30 = vector.extract_strided_slice %13 {offsets = [0, 128], sizes = [8, 128], strides = [1, 1]} : vector<8x384xf32> to vector<8x128xf32>
    %31 = arith.addf %30, %29 : vector<8x128xf32>
    %32 = arith.negf %31 : vector<8x128xf32>
    %33 = math.exp %32 : vector<8x128xf32>
    %cst_14 = arith.constant 1.000000e+00 : f32
    %34 = vector.broadcast %cst_14 : f32 to vector<8x128xf32>
    %35 = arith.addf %34, %33 : vector<8x128xf32>
    %36 = arith.divf %34, %35 : vector<8x128xf32>
    %37 = arith.subf %9, %28 : vector<8x128xf32>
    %38 = arith.mulf %36, %37 : vector<8x128xf32>
    %39 = arith.addf %28, %38 : vector<8x128xf32>
    %40 = arith.index_cast %c0_i32_8 : i32 to index
    %c0_15 = arith.constant 0 : index
    %c0_16 = arith.constant 0 : index
    %41 = vector.load %arg5[%40, %c0_15, %c0_16] : memref<4x8x128xf32, #tpu.memory_space<vmem>>, vector<1x8x128xf32>
    %42 = vector.shape_cast %41 : vector<1x8x128xf32> to vector<8x128xf32>
    %43 = vector.shape_cast %39 : vector<8x128xf32> to vector<1x8x128xf32>
    tpu.vector_store %arg5[%40, %c0_15, %c0_16], %43 {strides = array<i32>} : memref<4x8x128xf32, #tpu.memory_space<vmem>>, vector<1x8x128xf32>,
    %c1_i32 = arith.constant 1 : i32
    %44 = arith.index_cast %c1_i32 : i32 to index
    %c0_17 = arith.constant 0 : index
    %c0_18 = arith.constant 0 : index
    %45 = vector.load %arg2[%44, %c0_17, %c0_18] : memref<4x8x384xbf16, #tpu.memory_space<vmem>>, vector<1x8x384xbf16>
    %46 = vector.shape_cast %45 : vector<1x8x384xbf16> to vector<8x384xbf16>
    %47 = arith.extf %46 : vector<8x384xbf16> to vector<8x384xf32>
    %48 = arith.truncf %39 : vector<8x128xf32> to vector<8x128xbf16>
    %cst_19 = arith.constant dense<0.000000e+00> : vector<8x128xf32>
    %49 = tpu.matmul %48, %3, %cst_19 {dimension_numbers = #tpu.dot_dimension_numbers<[1], [0], [0], [1], [0, 0, 1, 1], [], []>} : vector<8x128xbf16>, vector<128x128xbf16>, vector<8x128xf32> -> vector<8x128xf32>
    %50 = vector.extract_strided_slice %47 {offsets = [0, 0], sizes = [8, 128], strides = [1, 1]} : vector<8x384xf32> to vector<8x128xf32>
    %51 = arith.addf %50, %49 : vector<8x128xf32>
    %52 = arith.negf %51 : vector<8x128xf32>
    %53 = math.exp %52 : vector<8x128xf32>
    %cst_20 = arith.constant 1.000000e+00 : f32
    %54 = vector.broadcast %cst_20 : f32 to vector<8x128xf32>
    %55 = arith.addf %54, %53 : vector<8x128xf32>
    %56 = arith.divf %54, %55 : vector<8x128xf32>
    %cst_21 = arith.constant dense<0.000000e+00> : vector<8x128xf32>
    %57 = tpu.matmul %48, %5, %cst_21 {dimension_numbers = #tpu.dot_dimension_numbers<[1], [0], [0], [1], [0, 0, 1, 1], [], []>} : vector<8x128xbf16>, vector<128x128xbf16>, vector<8x128xf32> -> vector<8x128xf32>
    %58 = vector.extract_strided_slice %47 {offsets = [0, 256], sizes = [8, 128], strides = [1, 1]} : vector<8x384xf32> to vector<8x128xf32>
    %59 = arith.addf %57, %8 : vector<8x128xf32>
    %60 = arith.mulf %56, %59 : vector<8x128xf32>
    %61 = arith.addf %58, %60 : vector<8x128xf32>
    %62 = math.tanh %61 : vector<8x128xf32>
    %cst_22 = arith.constant dense<0.000000e+00> : vector<8x128xf32>
    %63 = tpu.matmul %48, %4, %cst_22 {dimension_numbers = #tpu.dot_dimension_numbers<[1], [0], [0], [1], [0, 0, 1, 1], [], []>} : vector<8x128xbf16>, vector<128x128xbf16>, vector<8x128xf32> -> vector<8x128xf32>
    %64 = vector.extract_strided_slice %47 {offsets = [0, 128], sizes = [8, 128], strides = [1, 1]} : vector<8x384xf32> to vector<8x128xf32>
    %65 = arith.addf %64, %63 : vector<8x128xf32>
    %66 = arith.negf %65 : vector<8x128xf32>
    %67 = math.exp %66 : vector<8x128xf32>
    %cst_23 = arith.constant 1.000000e+00 : f32
    %68 = vector.broadcast %cst_23 : f32 to vector<8x128xf32>
    %69 = arith.addf %68, %67 : vector<8x128xf32>
    %70 = arith.divf %68, %69 : vector<8x128xf32>
    %71 = arith.subf %39, %62 : vector<8x128xf32>
    %72 = arith.mulf %70, %71 : vector<8x128xf32>
    %73 = arith.addf %62, %72 : vector<8x128xf32>
    %74 = arith.index_cast %c1_i32 : i32 to index
    %c0_24 = arith.constant 0 : index
    %c0_25 = arith.constant 0 : index
    %75 = vector.load %arg5[%74, %c0_24, %c0_25] : memref<4x8x128xf32, #tpu.memory_space<vmem>>, vector<1x8x128xf32>
    %76 = vector.shape_cast %75 : vector<1x8x128xf32> to vector<8x128xf32>
    %77 = vector.shape_cast %73 : vector<8x128xf32> to vector<1x8x128xf32>
    tpu.vector_store %arg5[%74, %c0_24, %c0_25], %77 {strides = array<i32>} : memref<4x8x128xf32, #tpu.memory_space<vmem>>, vector<1x8x128xf32>,
    %c2_i32 = arith.constant 2 : i32
    %78 = arith.index_cast %c2_i32 : i32 to index
    %c0_26 = arith.constant 0 : index
    %c0_27 = arith.constant 0 : index
    %79 = vector.load %arg2[%78, %c0_26, %c0_27] : memref<4x8x384xbf16, #tpu.memory_space<vmem>>, vector<1x8x384xbf16>
    %80 = vector.shape_cast %79 : vector<1x8x384xbf16> to vector<8x384xbf16>
    %81 = arith.extf %80 : vector<8x384xbf16> to vector<8x384xf32>
    %82 = arith.truncf %73 : vector<8x128xf32> to vector<8x128xbf16>
    %cst_28 = arith.constant dense<0.000000e+00> : vector<8x128xf32>
    %83 = tpu.matmul %82, %3, %cst_28 {dimension_numbers = #tpu.dot_dimension_numbers<[1], [0], [0], [1], [0, 0, 1, 1], [], []>} : vector<8x128xbf16>, vector<128x128xbf16>, vector<8x128xf32> -> vector<8x128xf32>
    %84 = vector.extract_strided_slice %81 {offsets = [0, 0], sizes = [8, 128], strides = [1, 1]} : vector<8x384xf32> to vector<8x128xf32>
    %85 = arith.addf %84, %83 : vector<8x128xf32>
    %86 = arith.negf %85 : vector<8x128xf32>
    %87 = math.exp %86 : vector<8x128xf32>
    %cst_29 = arith.constant 1.000000e+00 : f32
    %88 = vector.broadcast %cst_29 : f32 to vector<8x128xf32>
    %89 = arith.addf %88, %87 : vector<8x128xf32>
    %90 = arith.divf %88, %89 : vector<8x128xf32>
    %cst_30 = arith.constant dense<0.000000e+00> : vector<8x128xf32>
    %91 = tpu.matmul %82, %5, %cst_30 {dimension_numbers = #tpu.dot_dimension_numbers<[1], [0], [0], [1], [0, 0, 1, 1], [], []>} : vector<8x128xbf16>, vector<128x128xbf16>, vector<8x128xf32> -> vector<8x128xf32>
    %92 = vector.extract_strided_slice %81 {offsets = [0, 256], sizes = [8, 128], strides = [1, 1]} : vector<8x384xf32> to vector<8x128xf32>
    %93 = arith.addf %91, %8 : vector<8x128xf32>
    %94 = arith.mulf %90, %93 : vector<8x128xf32>
    %95 = arith.addf %92, %94 : vector<8x128xf32>
    %96 = math.tanh %95 : vector<8x128xf32>
    %cst_31 = arith.constant dense<0.000000e+00> : vector<8x128xf32>
    %97 = tpu.matmul %82, %4, %cst_31 {dimension_numbers = #tpu.dot_dimension_numbers<[1], [0], [0], [1], [0, 0, 1, 1], [], []>} : vector<8x128xbf16>, vector<128x128xbf16>, vector<8x128xf32> -> vector<8x128xf32>
    %98 = vector.extract_strided_slice %81 {offsets = [0, 128], sizes = [8, 128], strides = [1, 1]} : vector<8x384xf32> to vector<8x128xf32>
    %99 = arith.addf %98, %97 : vector<8x128xf32>
    %100 = arith.negf %99 : vector<8x128xf32>
    %101 = math.exp %100 : vector<8x128xf32>
    %cst_32 = arith.constant 1.000000e+00 : f32
    %102 = vector.broadcast %cst_32 : f32 to vector<8x128xf32>
    %103 = arith.addf %102, %101 : vector<8x128xf32>
    %104 = arith.divf %102, %103 : vector<8x128xf32>
    %105 = arith.subf %73, %96 : vector<8x128xf32>
    %106 = arith.mulf %104, %105 : vector<8x128xf32>
    %107 = arith.addf %96, %106 : vector<8x128xf32>
    %108 = arith.index_cast %c2_i32 : i32 to index
    %c0_33 = arith.constant 0 : index
    %c0_34 = arith.constant 0 : index
    %109 = vector.load %arg5[%108, %c0_33, %c0_34] : memref<4x8x128xf32, #tpu.memory_space<vmem>>, vector<1x8x128xf32>
    %110 = vector.shape_cast %109 : vector<1x8x128xf32> to vector<8x128xf32>
    %111 = vector.shape_cast %107 : vector<8x128xf32> to vector<1x8x128xf32>
    tpu.vector_store %arg5[%108, %c0_33, %c0_34], %111 {strides = array<i32>} : memref<4x8x128xf32, #tpu.memory_space<vmem>>, vector<1x8x128xf32>,
    %c3_i32 = arith.constant 3 : i32
    %112 = arith.index_cast %c3_i32 : i32 to index
    %c0_35 = arith.constant 0 : index
    %c0_36 = arith.constant 0 : index
    %113 = vector.load %arg2[%112, %c0_35, %c0_36] : memref<4x8x384xbf16, #tpu.memory_space<vmem>>, vector<1x8x384xbf16>
    %114 = vector.shape_cast %113 : vector<1x8x384xbf16> to vector<8x384xbf16>
    %115 = arith.extf %114 : vector<8x384xbf16> to vector<8x384xf32>
    %116 = arith.truncf %107 : vector<8x128xf32> to vector<8x128xbf16>
    %cst_37 = arith.constant dense<0.000000e+00> : vector<8x128xf32>
    %117 = tpu.matmul %116, %3, %cst_37 {dimension_numbers = #tpu.dot_dimension_numbers<[1], [0], [0], [1], [0, 0, 1, 1], [], []>} : vector<8x128xbf16>, vector<128x128xbf16>, vector<8x128xf32> -> vector<8x128xf32>
    %118 = vector.extract_strided_slice %115 {offsets = [0, 0], sizes = [8, 128], strides = [1, 1]} : vector<8x384xf32> to vector<8x128xf32>
    %119 = arith.addf %118, %117 : vector<8x128xf32>
    %120 = arith.negf %119 : vector<8x128xf32>
    %121 = math.exp %120 : vector<8x128xf32>
    %cst_38 = arith.constant 1.000000e+00 : f32
    %122 = vector.broadcast %cst_38 : f32 to vector<8x128xf32>
    %123 = arith.addf %122, %121 : vector<8x128xf32>
    %124 = arith.divf %122, %123 : vector<8x128xf32>
    %cst_39 = arith.constant dense<0.000000e+00> : vector<8x128xf32>
    %125 = tpu.matmul %116, %5, %cst_39 {dimension_numbers = #tpu.dot_dimension_numbers<[1], [0], [0], [1], [0, 0, 1, 1], [], []>} : vector<8x128xbf16>, vector<128x128xbf16>, vector<8x128xf32> -> vector<8x128xf32>
    %126 = vector.extract_strided_slice %115 {offsets = [0, 256], sizes = [8, 128], strides = [1, 1]} : vector<8x384xf32> to vector<8x128xf32>
    %127 = arith.addf %125, %8 : vector<8x128xf32>
    %128 = arith.mulf %124, %127 : vector<8x128xf32>
    %129 = arith.addf %126, %128 : vector<8x128xf32>
    %130 = math.tanh %129 : vector<8x128xf32>
    %cst_40 = arith.constant dense<0.000000e+00> : vector<8x128xf32>
    %131 = tpu.matmul %116, %4, %cst_40 {dimension_numbers = #tpu.dot_dimension_numbers<[1], [0], [0], [1], [0, 0, 1, 1], [], []>} : vector<8x128xbf16>, vector<128x128xbf16>, vector<8x128xf32> -> vector<8x128xf32>
    %132 = vector.extract_strided_slice %115 {offsets = [0, 128], sizes = [8, 128], strides = [1, 1]} : vector<8x384xf32> to vector<8x128xf32>
    %133 = arith.addf %132, %131 : vector<8x128xf32>
    %134 = arith.negf %133 : vector<8x128xf32>
    %135 = math.exp %134 : vector<8x128xf32>
    %cst_41 = arith.constant 1.000000e+00 : f32
    %136 = vector.broadcast %cst_41 : f32 to vector<8x128xf32>
    %137 = arith.addf %136, %135 : vector<8x128xf32>
    %138 = arith.divf %136, %137 : vector<8x128xf32>
    %139 = arith.subf %107, %130 : vector<8x128xf32>
    %140 = arith.mulf %138, %139 : vector<8x128xf32>
    %141 = arith.addf %130, %140 : vector<8x128xf32>
    %142 = arith.index_cast %c3_i32 : i32 to index
    %c0_42 = arith.constant 0 : index
    %c0_43 = arith.constant 0 : index
    %143 = vector.load %arg5[%142, %c0_42, %c0_43] : memref<4x8x128xf32, #tpu.memory_space<vmem>>, vector<1x8x128xf32>
    %144 = vector.shape_cast %143 : vector<1x8x128xf32> to vector<8x128xf32>
    %145 = vector.shape_cast %141 : vector<8x128xf32> to vector<1x8x128xf32>
    tpu.vector_store %arg5[%142, %c0_42, %c0_43], %145 {strides = array<i32>} : memref<4x8x128xf32, #tpu.memory_space<vmem>>, vector<1x8x128xf32>,
    %c4_i32 = arith.constant 4 : i32
    %c0_44 = arith.constant 0 : index
    %c0_45 = arith.constant 0 : index
    %146 = vector.load %arg6[%c0_44, %c0_45] : memref<8x128xf32, #tpu.memory_space<vmem>>, vector<8x128xf32>
    tpu.vector_store %arg6[%c0_44, %c0_45], %141 {strides = array<i32>} : memref<8x128xf32, #tpu.memory_space<vmem>>, vector<8x128xf32>,
    return
  }
  func.func @transform_0(%arg0: i32, %arg1: i32) -> (i32, i32, i32) {
    %c0_i32 = arith.constant 0 : i32
    %c0_i32_0 = arith.constant 0 : i32
    return %arg1, %arg0, %c0_i32 : i32, i32, i32
  }
  func.func @transform_1(%arg0: i32, %arg1: i32) -> (i32, i32) {
    %c0_i32 = arith.constant 0 : i32
    %c0_i32_0 = arith.constant 0 : i32
    %c0_i32_1 = arith.constant 0 : i32
    return %c0_i32, %c0_i32_0 : i32, i32
  }
  func.func @transform_2(%arg0: i32, %arg1: i32) -> (i32, i32) {
    %c0_i32 = arith.constant 0 : i32
    %c0_i32_0 = arith.constant 0 : i32
    %c0_i32_1 = arith.constant 0 : i32
    return %c0_i32, %c0_i32_0 : i32, i32
  }
  func.func @transform_3(%arg0: i32, %arg1: i32) -> (i32, i32, i32) {
    %c0_i32 = arith.constant 0 : i32
    %c0_i32_0 = arith.constant 0 : i32
    return %arg1, %arg0, %c0_i32 : i32, i32, i32
  }
}

</mosaic_0001>

<bundles_post_ra>
// kernel: tpu_custom_call.1
= control target key start
LH: loop header
LB: loop body
LE: loop exit
PB: predicated region body
PF: predicated region fallthrough
CT: control target
= control target key end

     0   :  { %8 = vsyncpa [#allocation4], 0  ;;  %s2402_s0 = inlined_call_operand.hbm [shape: bf16[8,8,384], index: 0, kind: input, shape index: {}]   ;;  %s2403_s1 = inlined_call_operand.hbm [shape: bf16[128,384], index: 1, kind: input, shape index: {}]   ;;  %s2404_s2 = inlined_call_operand.vmem [shape: f32[1,128], index: 2, kind: input, shape index: {}]   ;;  %s2405_s3 = inlined_call_operand.hbm [shape: f32[8,8,128], index: 3, kind: output, shape index: {}]  }
   0x1   :  { %10 = vsyncpa [#allocation4 + $0x1], 0 }
   0x2   :  { %11 = vsyncpa [#allocation7], 0 }
   0x3   :  { %12 = vsyncpa [#allocation5], 0 }
   0x4   :  { %14 = vsyncpa [#allocation5 + $0x1], 0  ;;  %s1868_s12 = smov 0   ;;  %s1870_s13 = smov 0  }
   0x5   :  { %s1872_s14 = smov 0   ;;  %s1874_s15 = smov 0  }
   0x6   :  { %s1876_s16 = smov 0   ;;  %s1878_s17 = smov 0  }
   0x7 LB: > { %s1137_s18 = sadd.s32 4294967295, %s1836_s17   ;;  %s1138_s19 = sadd.s32 4294967294, %s1836_s17   ;;  %s1836_s17 = sphi %s1878_s17, %s20_s17   ;;  %s1832_s16 = sphi %s1876_s16, %s2428_s16   ;;  %s1828_s15 = sphi %s1874_s15, %s2427_s15   ;;  %s1824_s14 = sphi %s1872_s14, %s2426_s14   ;;  %s1820_s13 = sphi %s1870_s13, %s2425_s13   ;;  %s1816_s12 = sphi %s1868_s12, %s2424_s12  }
   0x8   : > { %p54_p0 = scmp.ne.s32.totalorder %s1820_s13, %s1816_s12  ;;  %p1902_p1 = scmp.eq.s32.totalorder %s1137_s18, 0 }
   0x9   : > { %p1906_p2 = scmp.eq.s32.totalorder %s1137_s18, 1  ;;  %p128_p3 = scmp.eq.s32.totalorder %s1138_s19, 1 }
   0xa   : > { %s2410_s20 = scalar_select %p1902_p1, 1, 0 }
   0xb   : > { %s2411_s21 = scalar_select %p1906_p2, 1, 0 }
   0xc   : > { %p1912_p4 = por %p1902_p1, %p54_p0  ;;  %p1139_p5 = scmp.ge.s32.totalorder %s1836_s17, 1 }
   0xd   : > { %p1917_p6 = por %p128_p3, %p54_p0  ;;  %p135_p7 = scmp.lt.s32.totalorder %s1836_s17, 3 }
   0xe   : > { %s2412_s22 = scalar_select %p1912_p4, 1, 0 }
   0xf   : > { %s2413_s23 = scalar_select %p1917_p6, 1, 0 }
  0x10   : > { %p1922_p8 = pnand %p1139_p5, %p135_p7  ;;  %s1838_s25 = smov [#allocation6]  }
  0x11   : > { %s147_s26 = sshll.u32 %s1838_s25, 4  ;;  %s29_s28 = sadd.s32 1, %s1832_s16  ;;  %s148_s26 = int_to_ptr.vmem [resolvable:$true] %s147_s26 }
  0x12   : > { %s2414_s24 = scalar_select %p1922_p8, 1, 0 }
  0x13   : > { %p1556_p9 = pneg %p1922_p8  ;;  %s1692_s4 = scalar_lea.hbm %s2403_s1, 3072 }
  0x14   : > { %p1693_p12 = scmp.ne.s32.totalorder %s2403_s1, %s1692_s4  ;;  %p1699_p5 = scmp.lt.u32.totalorder %s1692_s4, %s2403_s1 }
  0x15   : > { %p1931_p11 = pnand %p1556_p9, %p1902_p1 }
  0x17   : > { %p1694_p13 = pneg %p1931_p11 }
  0x19   : > { %p1695_p0 = pnand %p1694_p13, %p1693_p12 }
  0x1b   : > { %p1696_p3 = pneg %p1695_p0 }
  0x1d   : > { %p1701_p7 = pnand %p1699_p5, %p1696_p3 }
  0x1f   : > { %1704 = shalt.err (!%p1701_p7)
}
  0x20   : > { %s1705_s9 = scalar_lea.vmem %s148_s26, 3072  ;;  %p1713_p1 = scmp.lt.s32.totalorder %s148_s26, %s148_s26 }
  0x21   : > { %p1706_p9 = scmp.ne.s32.totalorder %s148_s26, %s1705_s9  ;;  %p1714_p4 = scmp.lt.s32.totalorder %s1705_s9, %s1705_s9 }
  0x23   : > { %p1708_p10 = pnand %p1706_p9, %p1694_p13  ;;  %p1715_p8 = por %p1714_p4, %p1713_p1 }
  0x25   : > { %p1709_p6 = pneg %p1708_p10 }
  0x27   : > { %p1716_p2 = pnand %p1715_p8, %p1709_p6 }
  0x29   : > { %1719 = shalt.err (!%p1716_p2)
}
  0x2a   : > { %s1839_s10 = smov 192   ;;  %s1840_s11 = smov 12  }
  0x2b   : > { %1559 = dma.hbm_to_vmem [thread:$0]  (!%p1931_p11), %s2403_s1, 3072, %s148_s26, [#allocation7], %s1839_s10, %s1839_s10, %s1840_s11  }
  0x2c   : > { %p30_p1 = scmp.ge.s32.totalorder %s29_s28, 2  ;;  %s41_s25 = sadd.s32 1, %s1824_s14 }
  0x2d   : > { %p48_p2 = scmp.ne.s32.totalorder %s1824_s14, %s1820_s13  ;;  %p49_p4 = scmp.eq.s32.totalorder %s1836_s17, 0 }
  0x2e   : > { %s2430_s28 = smov (%p30_p1, %s29_s28), 0  ;;  %p2416_p8 = scmp.ne.s32.totalorder %s2411_s21, 0 }
  0x2f   : > { %p50_p6 = por %p49_p4, %p48_p2  ;;  %s36_s27 = ssub.s32 %s1832_s16, %s2430_s28 }
  0x30   : > { %p1963_p10 = por %p2416_p8, %p48_p2  ;;  %p1569_p12 = scmp.lt.s32.totalorder %s1836_s17, 2 }
  0x31   : > { %p39_p13 = scmp.eq.s32.totalorder %s36_s27, 0  ;;  %s164_s30 = sand.u32 1, %s1824_s14  }
  0x32   : > { %s1545_s4 = smul.u32 48, %s164_s30  ;;  %p1975_p11 = pnand %p1569_p12, %p50_p6 }
  0x33   : > { %s1972_s5 = scalar_select %p39_p13, %s1824_s14, %s41_s25  }
  0x34   : > { %s1546_s26 = smul.u32 768, %s1832_s16  ;;  %s168_s6 = scalar_lea.vmem [#allocation3], %s1545_s4 }
  0x35   : > { %s178_s7 = sshll.u32 %s168_s6, 4  ;;  %s1986_s19 = scalar_lea.sflag [#allocation4], %s164_s30  ;;  %s1984_s7 = int_to_ptr.vmem [resolvable:$true] %s178_s7 }
  0x36   : > { %s1982_s18 = scalar_lea.hbm %s2402_s0, %s1546_s26  ;;  %p1722_p3 = pneg %p1975_p11 }
  0x37   : > { %s1720_s25 = scalar_lea.hbm %s1982_s18, 768  ;;  %s1725_s26 = scalar_lea.hbm %s2402_s0, 1536 }
  0x38   : > { %p1721_p0 = scmp.ne.s32.totalorder %s1982_s18, %s1720_s25  ;;  %p1726_p9 = scmp.lt.u32.totalorder %s1982_s18, %s2402_s0 }
  0x39   : > { %p1727_p1 = scmp.lt.u32.totalorder %s1725_s26, %s1720_s25  ;;  %p1729_p4 = scmp.lt.u32.totalorder %s1720_s25, %s1982_s18 }
  0x3a   : > { %p1723_p5 = pnand %p1722_p3, %p1721_p0 }
  0x3b   : > { %p1728_p2 = por %p1727_p1, %p1726_p9 }
  0x3c   : > { %p1724_p7 = pneg %p1723_p5 }
  0x3d   : > { %p1730_p6 = por %p1729_p4, %p1728_p2 }
  0x3f   : > { %p1731_p8 = pnand %p1730_p6, %p1724_p7 }
  0x41   : > { %1734 = shalt.err (!%p1731_p8)
}
  0x42   : > { %s1735_s30 = scalar_lea.vmem %s1984_s7, 768  ;;  %s1841_s21 = smov [#allocation3]  }
  0x43   : > { %p1736_p12 = scmp.ne.s32.totalorder %s1984_s7, %s1735_s30  ;;  %s1740_s27 = sshll.u32 %s1841_s21, 4  ;;  %s1741_s27 = int_to_ptr.vmem [resolvable:$false] %s1740_s27 }
  0x44   : > { %s1742_s4 = scalar_lea.vmem %s1741_s27, 1536  ;;  %p1743_p5 = scmp.lt.s32.totalorder %s1984_s7, %s1741_s27 }
  0x45   : > { %p1738_p13 = pnand %p1736_p12, %p1722_p3  ;;  %p1744_p9 = scmp.lt.s32.totalorder %s1742_s4, %s1735_s30 }
  0x47   : > { %p1739_p0 = pneg %p1738_p13  ;;  %p1745_p1 = por %p1744_p9, %p1743_p5 }
  0x49   : > { %p1746_p2 = pnand %p1745_p1, %p1739_p0 }
  0x4b   : > { %1749 = shalt.err (!%p1746_p2)
}
  0x4c   : > { %1563 = dma.hbm_to_vmem [thread:$0]  (!%p1975_p11), %s1982_s18, 768, %s1984_s7, %s1986_s19, %s1839_s10, %s1839_s10, %s1840_s11  }
  0x4d   : > { %p2419_p3 = scmp.ne.s32.totalorder %s2414_s24, 0 }
  0x4e   : > { %s2020_s25 = sand.u32 (!%p2419_p3), 1, %s1820_s13   ;;  %p2420_p7 = scmp.ne.s32.totalorder (!%p2419_p3), %s2412_s22, 0 }
  0x4f   : > { %190 = sbr.rel (%p2419_p3) target bundleno = 1258 (0x4ea), region = 32  ;;  %s193_s6 = scalar_lea.sflag (!%p2419_p3), [#allocation4], %s2020_s25 }
  0x50   : > { %s1547_s26 = smul.u32 (!%p2419_p3), 48, %s2020_s25 }
  0x52   : > { %s2024_s9 = scalar_lea.vmem (!%p2419_p3), [#allocation3], %s1547_s26 }
  0x56   : > { %1803 = dma.done.wait (%p2420_p7), %s193_s6, 768  }
  0x57   : > { %1805 = vsyncadd (%p2420_p7), %s193_s6, 4294966528  ;;  %p2421_p11 = scmp.ne.s32.totalorder %s2410_s20, 0 }
  0x59   : > { %1807 = dma.done.wait (%p2421_p11), [#allocation7], 3072  }
  0x5a   : > { %1809 = vsyncadd (%p2421_p11), [#allocation7], 4294964224  ;;  %s1147_s24 = sshll.u32 %s2020_s25, 5  ;;  %p1148_p4 = scmp.ne.s32.totalorder %s1828_s15, 0 }
  0x5b   : > { %s2035_s10 = scalar_lea.vmem [#allocation8], %s1147_s24  ;;  %v1842_v0 = vmov (!%p1148_p4), 0.0  }
  0x5c   : > { %229 = sbr.rel (%p1148_p4) target bundleno = 99 (0x63), region = 44  ;;  %230 = vst [vmem:[#allocation2] sm:$0xff] (!%p1148_p4), %v1842_v0 }
  0x63 PF: > { %v1843_v1 = vmov 0.0   ;;  %v2039_v2 = vld [vmem:[#allocation6] ss:$12 sps:$4 sm:$0xff]   ;;  %vm1844_vm0 = vmmov 0   ;;  %v2047_v3 = vld [vmem:[#allocation6 + $0x18] ss:$12 sps:$4 sm:$0xff]  }
  0x64   : > { %1305 = vmatprep.subr.bf16.mxu0 %v1843_v1  ;;  %1325 = vmatprep.subr.bf16.mxu1 %v1843_v1  ;;  %v2051_v4 = vld [vmem:[#allocation6 + $0x30] ss:$12 sps:$4 sm:$0xff]   ;;  %v2054_v5 = vld [vmem:[#allocation6 + $0x8] ss:$12 sps:$4 sm:$0xff]   ;;  %v2057_v6 = vld [vmem:[#allocation6 + $0x20] ss:$12 sps:$4 sm:$0xff]  }
  0x65   : > { %1321 = vmatprep.mubr.msk.bf16.mxu0 %vm1844_vm0, %v1843_v1  ;;  %1341 = vmatprep.mubr.msk.bf16.mxu1 %vm1844_vm0, %v1843_v1  ;;  %v2060_v7 = vld [vmem:[#allocation6 + $0x48] ss:$12 sps:$4 sm:$0xff]   ;;  %v2065_v8 = vld [vmem:[#allocation6 + $0x38] ss:$12 sps:$4 sm:$0xff]   ;;  %v2068_v9 = vld [vmem:[#allocation6 + $0x60] ss:$12 sps:$4 sm:$0xff]  }
  0x66   : > { %1306 = vmatpush3.bf16.msra.mxu0 %v2039_v2  ;;  %1326 = vmatpush3.bf16.msra.mxu1 %v2054_v5  ;;  %v2073_v10 = vld [vmem:[#allocation6 + $0x50] ss:$12 sps:$4 sm:$0xff]   ;;  %v2076_v11 = vld [vmem:[#allocation6 + $0x78] ss:$12 sps:$4 sm:$0xff]   ;;  %v2081_v12 = vld [vmem:[#allocation6 + $0x68] ss:$12 sps:$4 sm:$0xff]  }
  0x67   : > { %1307 = vmatprep.subr.bf16.mxu0 %v1843_v1  ;;  %1327 = vmatprep.subr.bf16.mxu1 %v1843_v1  ;;  %v2084_v13 = vld [vmem:[#allocation6 + $0x90] ss:$12 sps:$4 sm:$0xff]   ;;  %v2089_v14 = vld [vmem:[#allocation6 + $0x80] ss:$12 sps:$4 sm:$0xff]   ;;  %v2092_v15 = vld [vmem:[#allocation6 + $0xa8] ss:$12 sps:$4 sm:$0xff]  }
  0x68   : > { %v2094_v16 = vld [vmem:[#allocation2] sm:$0xff]  ;;  %v2104_v19 = vld [vmem:[#allocation6 + $0x4] ss:$12 sps:$4 sm:$0xff]   ;;  %v2120_v22 = vld [vmem:[#allocation6 + $0x34] ss:$12 sps:$4 sm:$0xff]   ;;  %s1196_s11 = sshll.u32 %s1828_s15, 9 }
  0x69   : > { %v292_v17 = vpack.c.bf16 %v2094_v16, %v2094_v16  ;;  %v2101_v18 = vld [vmem:[#allocation6 + $0x98] ss:$12 sps:$4 sm:$0xff]   ;;  %v2109_v20 = vld [vmem:[#allocation6 + $0xb0] ss:$12 sps:$4 sm:$0xff]   ;;  %v2146_v26 = vld [vmem:[#allocation6 + $0x94] ss:$12 sps:$4 sm:$0xff]   ;;  %s2350_s19 = scalar_lea.hbm %s2405_s3, %s1196_s11 }
  0x6a   : > { %1308 = vmatpush3.bf16.msra.mxu0 %v2047_v3  ;;  %1328 = vmatpush3.bf16.msra.mxu1 %v2057_v6  ;;  %v2112_v21 = vld [vmem:[#allocation6 + $0x1c] ss:$12 sps:$4 sm:$0xff]   ;;  %v2128_v23 = vld [vmem:[#allocation6 + $0x4c] ss:$12 sps:$4 sm:$0xff]   ;;  %v2134_v24 = vld [vmem:[#allocation6 + $0x64] ss:$12 sps:$4 sm:$0xff]  }
  0x6b   : > { %1309 = vmatprep.subr.bf16.mxu0 %v1843_v1  ;;  %1329 = vmatprep.subr.bf16.mxu1 %v1843_v1  ;;  %v2140_v25 = vld [vmem:[#allocation6 + $0x7c] ss:$12 sps:$4 sm:$0xff]   ;;  %v2152_v27 = vld [vmem:[#allocation6 + $0xac] ss:$12 sps:$4 sm:$0xff]   ;;  %v287_v28 = vld [vmem:[%s2024_s9] sm:$0xff]  ;;  %s1041_s7 = sshll.u32 %s2035_s10, 4  ;;  %s2352_s7 = int_to_ptr.vmem [resolvable:$true] %s1041_s7 }
  0x6c   : > { %v289_v29 = vunpack.c.l.bf16 %v287_v28  ;;  %v2186_v42 = vld [vmem:[%s2404_s2] ss:$0 sm:$0xff]  ;;  %v290_v46 = vunpack.c.h.bf16 %v287_v28  ;;  %v1176_v0 = vld [vmem:[%s2024_s9 + $0xc] sm:$0xff]  ;;  %s1027_s30 = scalar_lea.sflag [#allocation5], %s2020_s25  ;;  %s1750_s21 = scalar_lea.vmem %s2352_s7, 512 }
  0x6d   : > { %v2190_v51 = vld [vmem:[%s2024_s9 + $0x8] ss:$12 sps:$4 sm:$0xff]   ;;  %p1751_p6 = scmp.ne.s32.totalorder %s2352_s7, %s1750_s21  ;;  %s1845_s15 = smov [#allocation8]  }
  0x6e   : > { %1310 = vmatpush3.bf16.msra.mxu0 %v2051_v4  ;;  %1330 = vmatpush3.bf16.msra.mxu1 %v2065_v8  ;;  %v291_v54 = vunpack.c.l.bf16 %v2190_v51  ;;  %s1754_s27 = sshll.u32 %s1845_s15, 4  ;;  %s1755_s27 = int_to_ptr.vmem [resolvable:$false] %s1754_s27 }
  0x6f   : > { %1311 = vmatprep.subr.bf16.mxu0 %v1843_v1  ;;  %1331 = vmatprep.subr.bf16.mxu1 %v1843_v1  ;;  %p1752_p8 = pnand %p1751_p6, %p1963_p10  ;;  %s1756_s4 = scalar_lea.vmem %s1755_s27, 1024 }
  0x70   : > { %p1757_p13 = scmp.lt.s32.totalorder %s2352_s7, %s1755_s27  ;;  %p1758_p0 = scmp.lt.s32.totalorder %s1756_s4, %s1750_s21 }
  0x71   : > { %p1753_p12 = pneg %p1752_p8 }
  0x72   : > { %1312 = vmatpush3.bf16.msra.mxu0 %v2060_v7  ;;  %1332 = vmatpush3.bf16.msra.mxu1 %v2073_v10  ;;  %p1759_p5 = por %p1758_p0, %p1757_p13 }
  0x73   : > { %1313 = vmatprep.subr.bf16.mxu0 %v1843_v1  ;;  %1333 = vmatprep.subr.bf16.mxu1 %v1843_v1 }
  0x74   : > { %p1760_p9 = pnand %p1759_p5, %p1753_p12 }
  0x76   : > { %1314 = vmatpush3.bf16.msra.mxu0 %v2068_v9  ;;  %1334 = vmatpush3.bf16.msra.mxu1 %v2081_v12 }
  0x77   : > { %1315 = vmatprep.subr.bf16.mxu0 %v1843_v1  ;;  %1335 = vmatprep.subr.bf16.mxu1 %v1843_v1 }
  0x7a   : > { %1316 = vmatpush3.bf16.msra.mxu0 %v2076_v11  ;;  %1336 = vmatpush3.bf16.msra.mxu1 %v2089_v14 }
  0x7b   : > { %1317 = vmatprep.subr.bf16.mxu0 %v1843_v1  ;;  %1337 = vmatprep.subr.bf16.mxu1 %v1843_v1 }
  0x7e   : > { %1318 = vmatpush3.bf16.msra.mxu0 %v2084_v13  ;;  %1338 = vmatpush3.bf16.msra.mxu1 %v2101_v18 }
  0x7f   : > { %1319 = vmatprep.subr.bf16.mxu0 %v1843_v1  ;;  %1339 = vmatprep.subr.bf16.mxu1 %v1843_v1 }
  0x82   : > { %1320 = vmatpush3.bf16.msra.mxu0 %v2092_v15  ;;  %1340 = vmatpush3.bf16.msra.mxu1 %v2109_v20 }
  0x83   : > { %1345 = vmatprep.subr.bf16.mxu0 %v1843_v1  ;;  %1365 = vmatprep.subr.bf16.mxu1 %v1843_v1 }
  0x85   : > { %1322 = vmatmul.mubr.bf16.vlgmr.msra.gmra.mrb[0].mxu0 %v292_v17  ;;  %1342 = vmatmul.mubr.bf16.vlgmr.msra.gmra.mrb[0].mxu1 %v292_v17 }
  0x86   : > { %1346 = vmatpush3.bf16.msra.mxu0 %v2104_v19  ;;  %1361 = vmatprep.mubr.msk.bf16.mxu0 %vm1844_vm0, %v1843_v1 }
  0x87   : > { %1347 = vmatprep.subr.bf16.mxu0 %v1843_v1  ;;  %1366 = vmatpush3.bf16.msra.mxu1 %v2039_v2 }
  0x88   : > { %1381 = vmatprep.mubr.msk.bf16.mxu1 %vm1844_vm0, %v1843_v1  ;;  %1367 = vmatprep.subr.bf16.mxu1 %v1843_v1 }
  0x8a   : > { %1348 = vmatpush3.bf16.msra.mxu0 %v2112_v21 }
  0x8b   : > { %1349 = vmatprep.subr.bf16.mxu0 %v1843_v1  ;;  %1368 = vmatpush3.bf16.msra.mxu1 %v2047_v3 }
  0x8c   : > { %1369 = vmatprep.subr.bf16.mxu1 %v1843_v1 }
  0x8e   : > { %1350 = vmatpush3.bf16.msra.mxu0 %v2120_v22 }
  0x8f   : > { %1351 = vmatprep.subr.bf16.mxu0 %v1843_v1  ;;  %1370 = vmatpush3.bf16.msra.mxu1 %v2051_v4 }
  0x90   : > { %1371 = vmatprep.subr.bf16.mxu1 %v1843_v1 }
  0x92   : > { %1352 = vmatpush3.bf16.msra.mxu0 %v2128_v23 }
  0x93   : > { %1353 = vmatprep.subr.bf16.mxu0 %v1843_v1  ;;  %1372 = vmatpush3.bf16.msra.mxu1 %v2060_v7 }
  0x94   : > { %1373 = vmatprep.subr.bf16.mxu1 %v1843_v1 }
  0x96   : > { %1354 = vmatpush3.bf16.msra.mxu0 %v2134_v24 }
  0x97   : > { %1355 = vmatprep.subr.bf16.mxu0 %v1843_v1  ;;  %1374 = vmatpush3.bf16.msra.mxu1 %v2068_v9 }
  0x98   : > { %1375 = vmatprep.subr.bf16.mxu1 %v1843_v1 }
  0x9a   : > { %1356 = vmatpush3.bf16.msra.mxu0 %v2140_v25 }
  0x9b   : > { %1357 = vmatprep.subr.bf16.mxu0 %v1843_v1  ;;  %1376 = vmatpush3.bf16.msra.mxu1 %v2076_v11 }
  0x9c   : > { %1377 = vmatprep.subr.bf16.mxu1 %v1843_v1 }
  0x9e   : > { %1358 = vmatpush3.bf16.msra.mxu0 %v2146_v26 }
  0x9f   : > { %1359 = vmatprep.subr.bf16.mxu0 %v1843_v1  ;;  %1378 = vmatpush3.bf16.msra.mxu1 %v2084_v13 }
  0xa0   : > { %1379 = vmatprep.subr.bf16.mxu1 %v1843_v1 }
  0xa2   : > { %1360 = vmatpush3.bf16.msra.mxu0 %v2152_v27 }
  0xa3   : > { %1385 = vmatprep.subr.bf16.mxu0 %v1843_v1  ;;  %1380 = vmatpush3.bf16.msra.mxu1 %v2092_v15 }
  0xa4   : > { %1405 = vmatprep.subr.bf16.mxu1 %v1843_v1 }
  0xa5   : > { %1362 = vmatmul.mubr.bf16.vlgmr.msra.gmra.mrb[4].mxu0 %v292_v17 }
  0xa6   : > { %1386 = vmatpush3.bf16.msra.mxu0 %v2054_v5  ;;  %1401 = vmatprep.mubr.msk.bf16.mxu0 %vm1844_vm0, %v1843_v1 }
  0xa7   : > { %1387 = vmatprep.subr.bf16.mxu0 %v1843_v1 }
  0xaa   : > { %1388 = vmatpush3.bf16.msra.mxu0 %v2057_v6 }
  0xab   : > { %1389 = vmatprep.subr.bf16.mxu0 %v1843_v1 }
  0xae   : > { %1390 = vmatpush3.bf16.msra.mxu0 %v2065_v8 }
  0xaf   : > { %1391 = vmatprep.subr.bf16.mxu0 %v1843_v1 }
  0xb2   : > { %1392 = vmatpush3.bf16.msra.mxu0 %v2073_v10 }
  0xb3   : > { %1393 = vmatprep.subr.bf16.mxu0 %v1843_v1 }
  0xb6   : > { %1394 = vmatpush3.bf16.msra.mxu0 %v2081_v12 }
  0xb7   : > { %1395 = vmatprep.subr.bf16.mxu0 %v1843_v1 }
  0xba   : > { %1396 = vmatpush3.bf16.msra.mxu0 %v2089_v14 }
  0xbb   : > { %1397 = vmatprep.subr.bf16.mxu0 %v1843_v1 }
  0xbe   : > { %1398 = vmatpush3.bf16.msra.mxu0 %v2101_v18 }
  0xbf   : > { %1399 = vmatprep.subr.bf16.mxu0 %v1843_v1 }
  0xc2   : > { %1400 = vmatpush3.bf16.msra.mxu0 %v2109_v20 }
  0xc3   : > { %1425 = vmatprep.subr.bf16.mxu0 %v1843_v1 }
 0x158   : > { %v375_v30 = vpop.f32.mrb[0].mxu0  ;;  %v470_v36 = vpop.f32.mrb[0].mxu1 }
 0x159   : > { %v381_v31 = vadd.f32 %v375_v30, %v289_v29  ;;  %v1323_v32 = vpop.f32.mrb[1].mxu0  ;;  %v1343_v37 = vpop.f32.mrb[1].mxu1  ;;  %v471_v43 = vadd.f32 %v2186_v42, %v470_v36 }
 0x15a   : > { %v378_v33 = vpop.f32.mrb[2].mxu0  ;;  %v473_v38 = vpop.f32.mrb[2].mxu1 }
 0x15b   : > { %v1158_v34 = vmul.f32 -1.442695, %v381_v31  ;;  %v1324_v35 = vpop.f32.mrb[3].mxu0  ;;  %v1344_v39 = vpop.f32.mrb[3].mxu1 }
 0x15d   : > { %1652 = vpow2.f32 %v1158_v34 }
 0x167   : > { %v1653_v40 = vpop.eup %1652 }
 0x168   : > { %v385_v41 = vadd.f32 1.0, %v1653_v40 }
 0x16a   : > { %1654 = vrcp.f32 %v385_v41 }
 0x174   : > { %v1655_v44 = vpop.eup %1654 }
 0x175   : > { %v476_v45 = vmul.f32 %v1655_v44, %v471_v43  ;;  %v582_v43 = vunpack.c.h.bf16 %v1176_v0 }
 0x177   : > { %v477_v55 = vadd.f32 %v476_v45, %v291_v54 }
 0x178   : > { %v561_v47 = vpop.f32.mrb[4].mxu0 }
 0x179   : > { %v567_v48 = vadd.f32 %v561_v47, %v290_v46  ;;  %v1363_v49 = vpop.f32.mrb[5].mxu0 }
 0x17a   : > { %v564_v50 = vpop.f32.mrb[6].mxu0 }
 0x17b   : > { %v1175_v52 = vmul.f32 -1.442695, %v567_v48  ;;  %v1364_v53 = vpop.f32.mrb[7].mxu0  ;;  %v583_v50 = vunpack.c.h.bf16 %v2190_v51 }
 0x17d   : > { %1656 = vpow2.f32 %v1175_v52 }
 0x17e   : > { %1658 = vtanh.f32 %v477_v55 }
 0x187   : > { %v1657_v56 = vpop.eup %1656 }
 0x188   : > { %v571_v57 = vadd.f32 1.0, %v1657_v56  ;;  %v1659_v58 = vpop.eup %1658 }
 0x189   : > { %v574_v59 = vsub.f32 %v2094_v16, %v1659_v58  ;;  %v581_v16 = vunpack.c.l.bf16 %v1176_v0 }
 0x18a   : > { %1660 = vrcp.f32 %v571_v57 }
 0x194   : > { %v1661_v60 = vpop.eup %1660 }
 0x195   : > { %v575_v61 = vmul.f32 %v1661_v60, %v574_v59 }
 0x197   : > { %v2194_v62 = vadd.f32 %v1659_v58, %v575_v61 }
 0x199   : > { %577 = vst [vmem:[%s2035_s10] sm:$0xff] %v2194_v62  ;;  %v584_v63 = vpack.c.bf16 %v2194_v62, %v2194_v62 }
 0x19b   : > { %1382 = vmatmul.mubr.bf16.vlgmr.msra.gmra.mrb[4].mxu1 %v584_v63  ;;  %1402 = vmatmul.mubr.bf16.vlgmr.msra.gmra.mrb[8].mxu0 %v584_v63 }
 0x19c   : > { %1406 = vmatpush3.bf16.msra.mxu1 %v2104_v19  ;;  %1421 = vmatprep.mubr.msk.bf16.mxu1 %vm1844_vm0, %v1843_v1 }
 0x19d   : > { %1407 = vmatprep.subr.bf16.mxu1 %v1843_v1  ;;  %1426 = vmatpush3.bf16.msra.mxu0 %v2039_v2 }
 0x19e   : > { %1427 = vmatprep.subr.bf16.mxu0 %v1843_v1  ;;  %1441 = vmatprep.mubr.msk.bf16.mxu0 %vm1844_vm0, %v1843_v1 }
 0x1a0   : > { %1408 = vmatpush3.bf16.msra.mxu1 %v2112_v21 }
 0x1a1   : > { %1409 = vmatprep.subr.bf16.mxu1 %v1843_v1  ;;  %1428 = vmatpush3.bf16.msra.mxu0 %v2047_v3 }
 0x1a2   : > { %1429 = vmatprep.subr.bf16.mxu0 %v1843_v1 }
 0x1a4   : > { %1410 = vmatpush3.bf16.msra.mxu1 %v2120_v22 }
 0x1a5   : > { %1411 = vmatprep.subr.bf16.mxu1 %v1843_v1  ;;  %1430 = vmatpush3.bf16.msra.mxu0 %v2051_v4 }
 0x1a6   : > { %1431 = vmatprep.subr.bf16.mxu0 %v1843_v1 }
 0x1a8   : > { %1412 = vmatpush3.bf16.msra.mxu1 %v2128_v23 }
 0x1a9   : > { %1413 = vmatprep.subr.bf16.mxu1 %v1843_v1  ;;  %1432 = vmatpush3.bf16.msra.mxu0 %v2060_v7 }
 0x1aa   : > { %1433 = vmatprep.subr.bf16.mxu0 %v1843_v1 }
 0x1ac   : > { %1414 = vmatpush3.bf16.msra.mxu1 %v2134_v24 }
 0x1ad   : > { %1415 = vmatprep.subr.bf16.mxu1 %v1843_v1  ;;  %1434 = vmatpush3.bf16.msra.mxu0 %v2068_v9 }
 0x1ae   : > { %1435 = vmatprep.subr.bf16.mxu0 %v1843_v1 }
 0x1b0   : > { %1416 = vmatpush3.bf16.msra.mxu1 %v2140_v25 }
 0x1b1   : > { %1417 = vmatprep.subr.bf16.mxu1 %v1843_v1  ;;  %1436 = vmatpush3.bf16.msra.mxu0 %v2076_v11 }
 0x1b2   : > { %1437 = vmatprep.subr.bf16.mxu0 %v1843_v1 }
 0x1b4   : > { %1418 = vmatpush3.bf16.msra.mxu1 %v2146_v26 }
 0x1b5   : > { %1419 = vmatprep.subr.bf16.mxu1 %v1843_v1  ;;  %1438 = vmatpush3.bf16.msra.mxu0 %v2084_v13 }
 0x1b6   : > { %1439 = vmatprep.subr.bf16.mxu0 %v1843_v1 }
 0x1b8   : > { %1420 = vmatpush3.bf16.msra.mxu1 %v2152_v27 }
 0x1b9   : > { %1445 = vmatprep.subr.bf16.mxu1 %v1843_v1  ;;  %1440 = vmatpush3.bf16.msra.mxu0 %v2092_v15 }
 0x1ba   : > { %1465 = vmatprep.subr.bf16.mxu0 %v1843_v1 }
 0x1bb   : > { %1422 = vmatmul.mubr.bf16.vlgmr.msra.gmra.mrb[8].mxu1 %v584_v63 }
 0x1bc   : > { %1446 = vmatpush3.bf16.msra.mxu1 %v2054_v5  ;;  %1461 = vmatprep.mubr.msk.bf16.mxu1 %vm1844_vm0, %v1843_v1 }
 0x1bd   : > { %1447 = vmatprep.subr.bf16.mxu1 %v1843_v1 }
 0x1c0   : > { %1448 = vmatpush3.bf16.msra.mxu1 %v2057_v6 }
 0x1c1   : > { %1449 = vmatprep.subr.bf16.mxu1 %v1843_v1 }
 0x1c4   : > { %1450 = vmatpush3.bf16.msra.mxu1 %v2065_v8 }
 0x1c5   : > { %1451 = vmatprep.subr.bf16.mxu1 %v1843_v1 }
 0x1c8   : > { %1452 = vmatpush3.bf16.msra.mxu1 %v2073_v10 }
 0x1c9   : > { %1453 = vmatprep.subr.bf16.mxu1 %v1843_v1 }
 0x1cc   : > { %1454 = vmatpush3.bf16.msra.mxu1 %v2081_v12 }
 0x1cd   : > { %1455 = vmatprep.subr.bf16.mxu1 %v1843_v1 }
 0x1d0   : > { %1456 = vmatpush3.bf16.msra.mxu1 %v2089_v14 }
 0x1d1   : > { %1457 = vmatprep.subr.bf16.mxu1 %v1843_v1 }
 0x1d4   : > { %1458 = vmatpush3.bf16.msra.mxu1 %v2101_v18 }
 0x1d5   : > { %1459 = vmatprep.subr.bf16.mxu1 %v1843_v1 }
 0x1d8   : > { %1460 = vmatpush3.bf16.msra.mxu1 %v2109_v20 }
 0x1d9   : > { %1485 = vmatprep.subr.bf16.mxu1 %v1843_v1 }
 0x26e   : > { %v619_v17 = vpop.f32.mrb[4].mxu1  ;;  %v666_v28 = vpop.f32.mrb[8].mxu0 }
 0x26f   : > { %v625_v29 = vadd.f32 %v619_v17, %v581_v16  ;;  %v1383_v30 = vpop.f32.mrb[5].mxu1  ;;  %v1403_v31 = vpop.f32.mrb[9].mxu0  ;;  %v667_v39 = vadd.f32 %v2186_v42, %v666_v28  ;;  %v2320_v17 = vld [vmem:[%s2024_s9 + $0x20] ss:$12 sps:$4 sm:$0xff]  }
 0x270   : > { %v622_v32 = vpop.f32.mrb[6].mxu1  ;;  %v669_v33 = vpop.f32.mrb[10].mxu0  ;;  %v732_v30 = vunpack.c.l.bf16 %v2320_v17 }
 0x271   : > { %v1178_v34 = vmul.f32 -1.442695, %v625_v29  ;;  %v1384_v35 = vpop.f32.mrb[7].mxu1  ;;  %v1404_v36 = vpop.f32.mrb[11].mxu0 }
 0x273   : > { %1662 = vpow2.f32 %v1178_v34 }
 0x27d   : > { %v1663_v37 = vpop.eup %1662 }
 0x27e   : > { %v629_v38 = vadd.f32 1.0, %v1663_v37 }
 0x280   : > { %1664 = vrcp.f32 %v629_v38 }
 0x28a   : > { %v1665_v40 = vpop.eup %1664 }
 0x28b   : > { %v672_v41 = vmul.f32 %v1665_v40, %v667_v39 }
 0x28d   : > { %v673_v52 = vadd.f32 %v672_v41, %v583_v50 }
 0x28e   : > { %v709_v44 = vpop.f32.mrb[8].mxu1 }
 0x28f   : > { %v715_v45 = vadd.f32 %v709_v44, %v582_v43  ;;  %v1423_v46 = vpop.f32.mrb[9].mxu1 }
 0x290   : > { %v712_v47 = vpop.f32.mrb[10].mxu1 }
 0x291   : > { %v1179_v48 = vmul.f32 -1.442695, %v715_v45  ;;  %v1424_v49 = vpop.f32.mrb[11].mxu1 }
 0x293   : > { %1666 = vpow2.f32 %v1179_v48 }
 0x294   : > { %1668 = vtanh.f32 %v673_v52 }
 0x29d   : > { %v1667_v53 = vpop.eup %1666 }
 0x29e   : > { %v719_v54 = vadd.f32 1.0, %v1667_v53  ;;  %v1669_v55 = vpop.eup %1668 }
 0x29f   : > { %v722_v56 = vsub.f32 %v2194_v62, %v1669_v55 }
 0x2a0   : > { %1670 = vrcp.f32 %v719_v54 }
 0x2aa   : > { %v1671_v57 = vpop.eup %1670 }
 0x2ab   : > { %v723_v58 = vmul.f32 %v1671_v57, %v722_v56  ;;  %v881_v57 = vunpack.c.h.bf16 %v2320_v17 }
 0x2ad   : > { %v2258_v59 = vadd.f32 %v1669_v55, %v723_v58 }
 0x2af   : > { %1180 = vst [vmem:[%s2035_s10 + $0x8] sm:$0xff] %v2258_v59  ;;  %v733_v60 = vpack.c.bf16 %v2258_v59, %v2258_v59 }
 0x2b1   : > { %1442 = vmatmul.mubr.bf16.vlgmr.msra.gmra.mrb[12].mxu0 %v733_v60  ;;  %1462 = vmatmul.mubr.bf16.vlgmr.msra.gmra.mrb[12].mxu1 %v733_v60 }
 0x2b2   : > { %1466 = vmatpush3.bf16.msra.mxu0 %v2104_v19  ;;  %1481 = vmatprep.mubr.msk.bf16.mxu0 %vm1844_vm0, %v1843_v1 }
 0x2b3   : > { %1467 = vmatprep.subr.bf16.mxu0 %v1843_v1  ;;  %1486 = vmatpush3.bf16.msra.mxu1 %v2039_v2  ;;  %v1181_v2 = vld [vmem:[%s2024_s9 + $0x18] sm:$0xff] }
 0x2b4   : > { %1487 = vmatprep.subr.bf16.mxu1 %v1843_v1  ;;  %1501 = vmatprep.mubr.msk.bf16.mxu1 %vm1844_vm0, %v1843_v1  ;;  %v731_v61 = vunpack.c.h.bf16 %v1181_v2 }
 0x2b6   : > { %1468 = vmatpush3.bf16.msra.mxu0 %v2112_v21 }
 0x2b7   : > { %1469 = vmatprep.subr.bf16.mxu0 %v1843_v1  ;;  %1488 = vmatpush3.bf16.msra.mxu1 %v2047_v3  ;;  %v730_v3 = vunpack.c.l.bf16 %v1181_v2 }
 0x2b8   : > { %1489 = vmatprep.subr.bf16.mxu1 %v1843_v1 }
 0x2ba   : > { %1470 = vmatpush3.bf16.msra.mxu0 %v2120_v22 }
 0x2bb   : > { %1471 = vmatprep.subr.bf16.mxu0 %v1843_v1  ;;  %1490 = vmatpush3.bf16.msra.mxu1 %v2051_v4 }
 0x2bc   : > { %1491 = vmatprep.subr.bf16.mxu1 %v1843_v1 }
 0x2be   : > { %1472 = vmatpush3.bf16.msra.mxu0 %v2128_v23 }
 0x2bf   : > { %1473 = vmatprep.subr.bf16.mxu0 %v1843_v1  ;;  %1492 = vmatpush3.bf16.msra.mxu1 %v2060_v7 }
 0x2c0   : > { %1493 = vmatprep.subr.bf16.mxu1 %v1843_v1 }
 0x2c2   : > { %1474 = vmatpush3.bf16.msra.mxu0 %v2134_v24 }
 0x2c3   : > { %1475 = vmatprep.subr.bf16.mxu0 %v1843_v1  ;;  %1494 = vmatpush3.bf16.msra.mxu1 %v2068_v9 }
 0x2c4   : > { %1495 = vmatprep.subr.bf16.mxu1 %v1843_v1 }
 0x2c6   : > { %1476 = vmatpush3.bf16.msra.mxu0 %v2140_v25 }
 0x2c7   : > { %1477 = vmatprep.subr.bf16.mxu0 %v1843_v1  ;;  %1496 = vmatpush3.bf16.msra.mxu1 %v2076_v11 }
 0x2c8   : > { %1497 = vmatprep.subr.bf16.mxu1 %v1843_v1 }
 0x2ca   : > { %1478 = vmatpush3.bf16.msra.mxu0 %v2146_v26 }
 0x2cb   : > { %1479 = vmatprep.subr.bf16.mxu0 %v1843_v1  ;;  %1498 = vmatpush3.bf16.msra.mxu1 %v2084_v13 }
 0x2cc   : > { %1499 = vmatprep.subr.bf16.mxu1 %v1843_v1 }
 0x2ce   : > { %1480 = vmatpush3.bf16.msra.mxu0 %v2152_v27 }
 0x2cf   : > { %1505 = vmatprep.subr.bf16.mxu0 %v1843_v1  ;;  %1500 = vmatpush3.bf16.msra.mxu1 %v2092_v15 }
 0x2d0   : > { %1525 = vmatprep.subr.bf16.mxu1 %v1843_v1 }
 0x2d1   : > { %1482 = vmatmul.mubr.bf16.vlgmr.msra.gmra.mrb[16].mxu0 %v733_v60 }
 0x2d2   : > { %1506 = vmatpush3.bf16.msra.mxu0 %v2054_v5  ;;  %1521 = vmatprep.mubr.msk.bf16.mxu0 %vm1844_vm0, %v1843_v1 }
 0x2d3   : > { %1507 = vmatprep.subr.bf16.mxu0 %v1843_v1 }
 0x2d6   : > { %1508 = vmatpush3.bf16.msra.mxu0 %v2057_v6 }
 0x2d7   : > { %1509 = vmatprep.subr.bf16.mxu0 %v1843_v1 }
 0x2da   : > { %1510 = vmatpush3.bf16.msra.mxu0 %v2065_v8 }
 0x2db   : > { %1511 = vmatprep.subr.bf16.mxu0 %v1843_v1 }
 0x2de   : > { %1512 = vmatpush3.bf16.msra.mxu0 %v2073_v10 }
 0x2df   : > { %1513 = vmatprep.subr.bf16.mxu0 %v1843_v1 }
 0x2e2   : > { %1514 = vmatpush3.bf16.msra.mxu0 %v2081_v12 }
 0x2e3   : > { %1515 = vmatprep.subr.bf16.mxu0 %v1843_v1 }
 0x2e6   : > { %1516 = vmatpush3.bf16.msra.mxu0 %v2089_v14 }
 0x2e7   : > { %1517 = vmatprep.subr.bf16.mxu0 %v1843_v1 }
 0x2ea   : > { %1518 = vmatpush3.bf16.msra.mxu0 %v2101_v18 }
 0x2eb   : > { %1519 = vmatprep.subr.bf16.mxu0 %v1843_v1 }
 0x2ee   : > { %1520 = vmatpush3.bf16.msra.mxu0 %v2109_v20 }
 0x384   : > { %v768_v4 = vpop.f32.mrb[12].mxu0  ;;  %v815_v5 = vpop.f32.mrb[12].mxu1 }
 0x385   : > { %v774_v6 = vadd.f32 %v768_v4, %v730_v3  ;;  %v1443_v7 = vpop.f32.mrb[13].mxu0  ;;  %v1463_v8 = vpop.f32.mrb[13].mxu1  ;;  %v816_v18 = vadd.f32 %v2186_v42, %v815_v5 }
 0x386   : > { %v771_v9 = vpop.f32.mrb[14].mxu0  ;;  %v818_v10 = vpop.f32.mrb[14].mxu1 }
 0x387   : > { %v1183_v11 = vmul.f32 -1.442695, %v774_v6  ;;  %v1444_v12 = vpop.f32.mrb[15].mxu0  ;;  %v1464_v13 = vpop.f32.mrb[15].mxu1 }
 0x389   : > { %1672 = vpow2.f32 %v1183_v11 }
 0x393   : > { %v1673_v14 = vpop.eup %1672 }
 0x394   : > { %v778_v15 = vadd.f32 1.0, %v1673_v14 }
 0x396   : > { %1674 = vrcp.f32 %v778_v15 }
 0x3a0   : > { %v1675_v20 = vpop.eup %1674 }
 0x3a1   : > { %v821_v51 = vmul.f32 %v1675_v20, %v816_v18 }
 0x3a3   : > { %v822_v31 = vadd.f32 %v821_v51, %v732_v30 }
 0x3a4   : > { %v858_v62 = vpop.f32.mrb[16].mxu0 }
 0x3a5   : > { %v864_v63 = vadd.f32 %v858_v62, %v731_v61  ;;  %v1483_v0 = vpop.f32.mrb[17].mxu0 }
 0x3a6   : > { %v861_v16 = vpop.f32.mrb[18].mxu0 }
 0x3a7   : > { %v1184_v28 = vmul.f32 -1.442695, %v864_v63  ;;  %v1484_v29 = vpop.f32.mrb[19].mxu0 }
 0x3a9   : > { %1676 = vpow2.f32 %v1184_v28 }
 0x3aa   : > { %1678 = vtanh.f32 %v822_v31 }
 0x3b3   : > { %v1677_v32 = vpop.eup %1676 }
 0x3b4   : > { %v868_v33 = vadd.f32 1.0, %v1677_v32  ;;  %v1679_v34 = vpop.eup %1678 }
 0x3b5   : > { %v871_v35 = vsub.f32 %v2258_v59, %v1679_v34 }
 0x3b6   : > { %1680 = vrcp.f32 %v868_v33 }
 0x3c0   : > { %v1681_v36 = vpop.eup %1680 }
 0x3c1   : > { %v872_v37 = vmul.f32 %v1681_v36, %v871_v35 }
 0x3c3   : > { %v873_v38 = vadd.f32 %v1679_v34, %v872_v37 }
 0x3c5   : > { %1185 = vst [vmem:[%s2035_s10 + $0x10] sm:$0xff] %v873_v38  ;;  %v882_v39 = vpack.c.bf16 %v873_v38, %v873_v38 }
 0x3c7   : > { %1502 = vmatmul.mubr.bf16.vlgmr.msra.gmra.mrb[16].mxu1 %v882_v39  ;;  %1522 = vmatmul.mubr.bf16.vlgmr.msra.gmra.mrb[20].mxu0 %v882_v39 }
 0x3c8   : > { %1526 = vmatpush3.bf16.msra.mxu1 %v2104_v19  ;;  %1541 = vmatprep.mubr.msk.bf16.mxu1 %vm1844_vm0, %v1843_v1  ;;  %v1186_v19 = vld [vmem:[%s2024_s9 + $0x24] sm:$0xff] }
 0x3c9   : > { %1527 = vmatprep.subr.bf16.mxu1 %v1843_v1  ;;  %v880_v49 = vunpack.c.h.bf16 %v1186_v19 }
 0x3cc   : > { %1528 = vmatpush3.bf16.msra.mxu1 %v2112_v21  ;;  %v879_v21 = vunpack.c.l.bf16 %v1186_v19 }
 0x3cd   : > { %1529 = vmatprep.subr.bf16.mxu1 %v1843_v1 }
 0x3d0   : > { %1530 = vmatpush3.bf16.msra.mxu1 %v2120_v22 }
 0x3d1   : > { %1531 = vmatprep.subr.bf16.mxu1 %v1843_v1 }
 0x3d4   : > { %1532 = vmatpush3.bf16.msra.mxu1 %v2128_v23 }
 0x3d5   : > { %1533 = vmatprep.subr.bf16.mxu1 %v1843_v1 }
 0x3d8   : > { %1534 = vmatpush3.bf16.msra.mxu1 %v2134_v24 }
 0x3d9   : > { %1535 = vmatprep.subr.bf16.mxu1 %v1843_v1 }
 0x3dc   : > { %1536 = vmatpush3.bf16.msra.mxu1 %v2140_v25 }
 0x3dd   : > { %1537 = vmatprep.subr.bf16.mxu1 %v1843_v1 }
 0x3e0   : > { %1538 = vmatpush3.bf16.msra.mxu1 %v2146_v26 }
 0x3e1   : > { %1539 = vmatprep.subr.bf16.mxu1 %v1843_v1 }
 0x3e4   : > { %1540 = vmatpush3.bf16.msra.mxu1 %v2152_v27 }
 0x3e7   : > { %1542 = vmatmul.mubr.bf16.vlgmr.msra.gmra.mrb[20].mxu1 %v882_v39 }
 0x49a   : > { %v917_v22 = vpop.f32.mrb[16].mxu1  ;;  %v964_v23 = vpop.f32.mrb[20].mxu0 }
 0x49b   : > { %v923_v40 = vadd.f32 %v917_v22, %v879_v21  ;;  %v1503_v41 = vpop.f32.mrb[17].mxu1  ;;  %v1523_v24 = vpop.f32.mrb[21].mxu0  ;;  %v965_v1 = vadd.f32 %v2186_v42, %v964_v23 }
 0x49c   : > { %v920_v43 = vpop.f32.mrb[18].mxu1  ;;  %v967_v44 = vpop.f32.mrb[22].mxu0 }
 0x49d   : > { %v1188_v45 = vmul.f32 -1.442695, %v923_v40  ;;  %v1504_v25 = vpop.f32.mrb[19].mxu1  ;;  %v1524_v46 = vpop.f32.mrb[23].mxu0 }
 0x49f   : > { %1682 = vpow2.f32 %v1188_v45 }
 0x4a9   : > { %v1683_v47 = vpop.eup %1682 }
 0x4aa   : > { %v927_v26 = vadd.f32 1.0, %v1683_v47 }
 0x4ac   : > { %1684 = vrcp.f32 %v927_v26 }
 0x4b6   : > { %v1685_v27 = vpop.eup %1684 }
 0x4b7   : > { %v970_v48 = vmul.f32 %v1685_v27, %v965_v1 }
 0x4b9   : > { %v971_v58 = vadd.f32 %v970_v48, %v881_v57 }
 0x4ba   : > { %v1007_v50 = vpop.f32.mrb[20].mxu1 }
 0x4bb   : > { %v1013_v52 = vadd.f32 %v1007_v50, %v880_v49  ;;  %v1543_v53 = vpop.f32.mrb[21].mxu1 }
 0x4bc   : > { %v1010_v54 = vpop.f32.mrb[22].mxu1 }
 0x4bd   : > { %v1189_v55 = vmul.f32 -1.442695, %v1013_v52  ;;  %v1544_v56 = vpop.f32.mrb[23].mxu1 }
 0x4bf   : > { %1686 = vpow2.f32 %v1189_v55 }
 0x4c0   : > { %1688 = vtanh.f32 %v971_v58 }
 0x4c9   : > { %v1687_v59 = vpop.eup %1686 }
 0x4ca   : > { %v1017_v42 = vadd.f32 1.0, %v1687_v59  ;;  %v1689_v60 = vpop.eup %1688 }
 0x4cb   : > { %v1020_v2 = vsub.f32 %v873_v38, %v1689_v60 }
 0x4cc   : > { %1690 = vrcp.f32 %v1017_v42 }
 0x4d6   : > { %v1691_v3 = vpop.eup %1690 }
 0x4d7   : > { %v1021_v4 = vmul.f32 %v1691_v3, %v1020_v2 }
 0x4d9   : > { %v1022_v5 = vadd.f32 %v1689_v60, %v1021_v4 }
 0x4db   : > { %1025 = vst [vmem:[#allocation2] sm:$0xff] %v1022_v5  ;;  %1190 = vst [vmem:[%s2035_s10 + $0x18] sm:$0xff] %v1022_v5 }
 0x4dc   : > { %1763 = shalt.err (!%p1760_p9)
}
 0x4dd   : > { %s1764_s26 = scalar_lea.hbm %s2350_s19, 512  ;;  %s1768_s24 = scalar_lea.hbm %s2405_s3, 1024 }
 0x4de   : > { %p1765_p1 = scmp.ne.s32.totalorder %s2350_s19, %s1764_s26  ;;  %p1769_p7 = scmp.lt.u32.totalorder %s2350_s19, %s2405_s3 }
 0x4df   : > { %p1770_p11 = scmp.lt.u32.totalorder %s1768_s24, %s1764_s26  ;;  %p1772_p6 = scmp.lt.u32.totalorder %s1764_s26, %s2350_s19 }
 0x4e0   : > { %p1766_p2 = pnand %p1765_p1, %p1963_p10 }
 0x4e1   : > { %p1771_p4 = por %p1770_p11, %p1769_p7 }
 0x4e2   : > { %p1767_p3 = pneg %p1766_p2 }
 0x4e3   : > { %p1773_p8 = por %p1772_p6, %p1771_p4 }
 0x4e5   : > { %p1774_p12 = pnand %p1773_p8, %p1767_p3 }
 0x4e7   : > { %1777 = shalt.err (!%p1774_p12)
}
 0x4e8   : > { %s1846_s22 = smov 128   ;;  %s1847_s11 = smov 8  }
 0x4e9   : > { %1554 = dma.vmem_to_hbm [thread:$0]  (%p1963_p10), %s2352_s7, 512, %s2350_s19, %s1027_s30, %s1846_s22, %s1846_s22, %s1847_s11  }
 0x4ea PF: > { %s1056_s8 = sand.u32 1, %s1816_s12   ;;  %p2422_p13 = scmp.ne.s32.totalorder %s2413_s23, 0 }
 0x4eb   : > { %p2423_p0 = scmp.ge.s32.totalorder %s1836_s17, 2  ;;  %s1057_s18 = scalar_lea.sflag [#allocation5], %s1056_s8 }
 0x4ed   : > { %p1565_p5 = pnand %p2423_p0, %p2422_p13 }
 0x4ef   : > { %1811 = dma.done.wait (!%p1565_p5), %s1057_s18, 512  }
 0x4f0   : > { %1813 = vsyncadd (!%p1565_p5), %s1057_s18, 4294966784  ;;  %s20_s17 = sadd.s32 1, %s1836_s17   ;;  %s2424_s12 = smov %s1820_s13 }
 0x4f1   : > { %p17_p9 = scmp.ge.s32.totalorder %s20_s17, 4   ;;  %s2425_s13 = smov %s1824_s14 }
 0x4f2   : > { %s2426_s14 = smov %s1972_s5  ;;  %s2427_s15 = smov %s1832_s16 }
 0x4f3   : > { %s2428_s16 = smov %s2430_s28  ;;  %19 = sbr.rel (!%p17_p9) target bundleno = 7 (0x7), region = 91 }
 0x4fa   :  { %1062 = vsyncpa [#allocation4], 1 }
 0x4fb   :  { %1064 = vsyncpa [#allocation4 + $0x1], 1 }
 0x4fc   :  { %1065 = vsyncpa [#allocation7], 1 }
 0x4fd   :  { %1066 = vsyncpa [#allocation5], 1 }
 0x4fe   :  { %1068 = vsyncpa [#allocation5 + $0x1], 1 }

// kernel: tpu_custom_call.1
= control target key start
LH: loop header
LB: loop body
LE: loop exit
PB: predicated region body
PF: predicated region fallthrough
CT: control target
= control target key end

     0   :  { %8 = vsyncpa [#allocation4], 0  ;;  %s2402_s0 = inlined_call_operand.hbm [shape: bf16[8,8,384], index: 0, kind: input, shape index: {}]   ;;  %s2403_s1 = inlined_call_operand.hbm [shape: bf16[128,384], index: 1, kind: input, shape index: {}]   ;;  %s2404_s2 = inlined_call_operand.vmem [shape: f32[1,128], index: 2, kind: input, shape index: {}]   ;;  %s2405_s3 = inlined_call_operand.hbm [shape: f32[8,8,128], index: 3, kind: output, shape index: {}]  }
   0x1   :  { %10 = vsyncpa [#allocation4 + $0x1], 0 }
   0x2   :  { %11 = vsyncpa [#allocation7], 0 }
   0x3   :  { %12 = vsyncpa [#allocation5], 0 }
   0x4   :  { %14 = vsyncpa [#allocation5 + $0x1], 0  ;;  %s1868_s12 = smov 0   ;;  %s1870_s13 = smov 0  }
   0x5   :  { %s1872_s14 = smov 0   ;;  %s1874_s15 = smov 0  }
   0x6   :  { %s1876_s16 = smov 0   ;;  %s1878_s17 = smov 0  }
   0x7 LB: > { %s1137_s18 = sadd.s32 4294967295, %s1836_s17   ;;  %s1138_s19 = sadd.s32 4294967294, %s1836_s17   ;;  %s1836_s17 = sphi %s1878_s17, %s20_s17   ;;  %s1832_s16 = sphi %s1876_s16, %s2428_s16   ;;  %s1828_s15 = sphi %s1874_s15, %s2427_s15   ;;  %s1824_s14 = sphi %s1872_s14, %s2426_s14   ;;  %s1820_s13 = sphi %s1870_s13, %s2425_s13   ;;  %s1816_s12 = sphi %s1868_s12, %s2424_s12  }
   0x8   : > { %p54_p0 = scmp.ne.s32.totalorder %s1820_s13, %s1816_s12  ;;  %p1902_p1 = scmp.eq.s32.totalorder %s1137_s18, 0 }
   0x9   : > { %p1906_p2 = scmp.eq.s32.totalorder %s1137_s18, 1  ;;  %p128_p3 = scmp.eq.s32.totalorder %s1138_s19, 1 }
   0xa   : > { %s2410_s20 = scalar_select %p1902_p1, 1, 0 }
   0xb   : > { %s2411_s21 = scalar_select %p1906_p2, 1, 0 }
   0xc   : > { %p1912_p4 = por %p1902_p1, %p54_p0  ;;  %p1139_p5 = scmp.ge.s32.totalorder %s1836_s17, 1 }
   0xd   : > { %p1917_p6 = por %p128_p3, %p54_p0  ;;  %p135_p7 = scmp.lt.s32.totalorder %s1836_s17, 3 }
   0xe   : > { %s2412_s22 = scalar_select %p1912_p4, 1, 0 }
   0xf   : > { %s2413_s23 = scalar_select %p1917_p6, 1, 0 }
  0x10   : > { %p1922_p8 = pnand %p1139_p5, %p135_p7  ;;  %s1838_s25 = smov [#allocation6]  }
  0x11   : > { %s147_s26 = sshll.u32 %s1838_s25, 4  ;;  %s29_s28 = sadd.s32 1, %s1832_s16  ;;  %s148_s26 = int_to_ptr.vmem [resolvable:$true] %s147_s26 }
  0x12   : > { %s2414_s24 = scalar_select %p1922_p8, 1, 0 }
  0x13   : > { %p1556_p9 = pneg %p1922_p8  ;;  %s1692_s4 = scalar_lea.hbm %s2403_s1, 3072 }
  0x14   : > { %p1693_p12 = scmp.ne.s32.totalorder %s2403_s1, %s1692_s4  ;;  %p1699_p5 = scmp.lt.u32.totalorder %s1692_s4, %s2403_s1 }
  0x15   : > { %p1931_p11 = pnand %p1556_p9, %p1902_p1 }
  0x17   : > { %p1694_p13 = pneg %p1931_p11 }
  0x19   : > { %p1695_p0 = pnand %p1694_p13, %p1693_p12 }
  0x1b   : > { %p1696_p3 = pneg %p1695_p0 }
  0x1d   : > { %p1701_p7 = pnand %p1699_p5, %p1696_p3 }
  0x1f   : > { %1704 = shalt.err (!%p1701_p7)
}
  0x20   : > { %s1705_s9 = scalar_lea.vmem %s148_s26, 3072  ;;  %p1713_p1 = scmp.lt.s32.totalorder %s148_s26, %s148_s26 }
  0x21   : > { %p1706_p9 = scmp.ne.s32.totalorder %s148_s26, %s1705_s9  ;;  %p1714_p4 = scmp.lt.s32.totalorder %s1705_s9, %s1705_s9 }
  0x23   : > { %p1708_p10 = pnand %p1706_p9, %p1694_p13  ;;  %p1715_p8 = por %p1714_p4, %p1713_p1 }
  0x25   : > { %p1709_p6 = pneg %p1708_p10 }
  0x27   : > { %p1716_p2 = pnand %p1715_p8, %p1709_p6 }
  0x29   : > { %1719 = shalt.err (!%p1716_p2)
}
  0x2a   : > { %s1839_s10 = smov 192   ;;  %s1840_s11 = smov 12  }
  0x2b   : > { %1559 = dma.hbm_to_vmem [thread:$0]  (!%p1931_p11), %s2403_s1, 3072, %s148_s26, [#allocation7], %s1839_s10, %s1839_s10, %s1840_s11  }
  0x2c   : > { %p30_p1 = scmp.ge.s32.totalorder %s29_s28, 2  ;;  %s41_s25 = sadd.s32 1, %s1824_s14 }
  0x2d   : > { %p48_p2 = scmp.ne.s32.totalorder %s1824_s14, %s1820_s13  ;;  %p49_p4 = scmp.eq.s32.totalorder %s1836_s17, 0 }
  0x2e   : > { %s2430_s28 = smov (%p30_p1, %s29_s28), 0  ;;  %p2416_p8 = scmp.ne.s32.totalorder %s2411_s21, 0 }
  0x2f   : > { %p50_p6 = por %p49_p4, %p48_p2  ;;  %s36_s27 = ssub.s32 %s1832_s16, %s2430_s28 }
  0x30   : > { %p1963_p10 = por %p2416_p8, %p48_p2  ;;  %p1569_p12 = scmp.lt.s32.totalorder %s1836_s17, 2 }
  0x31   : > { %p39_p13 = scmp.eq.s32.totalorder %s36_s27, 0  ;;  %s164_s30 = sand.u32 1, %s1824_s14  }
  0x32   : > { %s1545_s4 = smul.u32 48, %s164_s30  ;;  %p1975_p11 = pnand %p1569_p12, %p50_p6 }
  0x33   : > { %s1972_s5 = scalar_select %p39_p13, %s1824_s14, %s41_s25  }
  0x34   : > { %s1546_s26 = smul.u32 768, %s1832_s16  ;;  %s168_s6 = scalar_lea.vmem [#allocation3], %s1545_s4 }
  0x35   : > { %s178_s7 = sshll.u32 %s168_s6, 4  ;;  %s1986_s19 = scalar_lea.sflag [#allocation4], %s164_s30  ;;  %s1984_s7 = int_to_ptr.vmem [resolvable:$true] %s178_s7 }
  0x36   : > { %s1982_s18 = scalar_lea.hbm %s2402_s0, %s1546_s26  ;;  %p1722_p3 = pneg %p1975_p11 }
  0x37   : > { %s1720_s25 = scalar_lea.hbm %s1982_s18, 768  ;;  %s1725_s26 = scalar_lea.hbm %s2402_s0, 1536 }
  0x38   : > { %p1721_p0 = scmp.ne.s32.totalorder %s1982_s18, %s1720_s25  ;;  %p1726_p9 = scmp.lt.u32.totalorder %s1982_s18, %s2402_s0 }
  0x39   : > { %p1727_p1 = scmp.lt.u32.totalorder %s1725_s26, %s1720_s25  ;;  %p1729_p4 = scmp.lt.u32.totalorder %s1720_s25, %s1982_s18 }
  0x3a   : > { %p1723_p5 = pnand %p1722_p3, %p1721_p0 }
  0x3b   : > { %p1728_p2 = por %p1727_p1, %p1726_p9 }
  0x3c   : > { %p1724_p7 = pneg %p1723_p5 }
  0x3d   : > { %p1730_p6 = por %p1729_p4, %p1728_p2 }
  0x3f   : > { %p1731_p8 = pnand %p1730_p6, %p1724_p7 }
  0x41   : > { %1734 = shalt.err (!%p1731_p8)
}
  0x42   : > { %s1735_s30 = scalar_lea.vmem %s1984_s7, 768  ;;  %s1841_s21 = smov [#allocation3]  }
  0x43   : > { %p1736_p12 = scmp.ne.s32.totalorder %s1984_s7, %s1735_s30  ;;  %s1740_s27 = sshll.u32 %s1841_s21, 4  ;;  %s1741_s27 = int_to_ptr.vmem [resolvable:$false] %s1740_s27 }
  0x44   : > { %s1742_s4 = scalar_lea.vmem %s1741_s27, 1536  ;;  %p1743_p5 = scmp.lt.s32.totalorder %s1984_s7, %s1741_s27 }
  0x45   : > { %p1738_p13 = pnand %p1736_p12, %p1722_p3  ;;  %p1744_p9 = scmp.lt.s32.totalorder %s1742_s4, %s1735_s30 }
  0x47   : > { %p1739_p0 = pneg %p1738_p13  ;;  %p1745_p1 = por %p1744_p9, %p1743_p5 }
  0x49   : > { %p1746_p2 = pnand %p1745_p1, %p1739_p0 }
  0x4b   : > { %1749 = shalt.err (!%p1746_p2)
}
  0x4c   : > { %1563 = dma.hbm_to_vmem [thread:$0]  (!%p1975_p11), %s1982_s18, 768, %s1984_s7, %s1986_s19, %s1839_s10, %s1839_s10, %s1840_s11  }
  0x4d   : > { %p2419_p3 = scmp.ne.s32.totalorder %s2414_s24, 0 }
  0x4e   : > { %s2020_s25 = sand.u32 (!%p2419_p3), 1, %s1820_s13   ;;  %p2420_p7 = scmp.ne.s32.totalorder (!%p2419_p3), %s2412_s22, 0 }
  0x4f   : > { %190 = sbr.rel (%p2419_p3) target bundleno = 1258 (0x4ea), region = 32  ;;  %s193_s6 = scalar_lea.sflag (!%p2419_p3), [#allocation4], %s2020_s25 }
  0x50   : > { %s1547_s26 = smul.u32 (!%p2419_p3), 48, %s2020_s25 }
  0x52   : > { %s2024_s9 = scalar_lea.vmem (!%p2419_p3), [#allocation3], %s1547_s26 }
  0x56   : > { %1803 = dma.done.wait (%p2420_p7), %s193_s6, 768  }
  0x57   : > { %1805 = vsyncadd (%p2420_p7), %s193_s6, 4294966528  ;;  %p2421_p11 = scmp.ne.s32.totalorder %s2410_s20, 0 }
  0x59   : > { %1807 = dma.done.wait (%p2421_p11), [#allocation7], 3072  }
  0x5a   : > { %1809 = vsyncadd (%p2421_p11), [#allocation7], 4294964224  ;;  %s1147_s24 = sshll.u32 %s2020_s25, 5  ;;  %p1148_p4 = scmp.ne.s32.totalorder %s1828_s15, 0 }
  0x5b   : > { %s2035_s10 = scalar_lea.vmem [#allocation8], %s1147_s24  ;;  %v1842_v0 = vmov (!%p1148_p4), 0.0  }
  0x5c   : > { %229 = sbr.rel (%p1148_p4) target bundleno = 99 (0x63), region = 44  ;;  %230 = vst [vmem:[#allocation2] sm:$0xff] (!%p1148_p4), %v1842_v0 }
  0x63 PF: > { %v1843_v1 = vmov 0.0   ;;  %v2039_v2 = vld [vmem:[#allocation6] ss:$12 sps:$4 sm:$0xff]   ;;  %vm1844_vm0 = vmmov 0   ;;  %v2047_v3 = vld [vmem:[#allocation6 + $0x18] ss:$12 sps:$4 sm:$0xff]  }
  0x64   : > { %1305 = vmatprep.subr.bf16.mxu0 %v1843_v1  ;;  %1325 = vmatprep.subr.bf16.mxu1 %v1843_v1  ;;  %v2051_v4 = vld [vmem:[#allocation6 + $0x30] ss:$12 sps:$4 sm:$0xff]   ;;  %v2054_v5 = vld [vmem:[#allocation6 + $0x8] ss:$12 sps:$4 sm:$0xff]   ;;  %v2057_v6 = vld [vmem:[#allocation6 + $0x20] ss:$12 sps:$4 sm:$0xff]  }
  0x65   : > { %1321 = vmatprep.mubr.msk.bf16.mxu0 %vm1844_vm0, %v1843_v1  ;;  %1341 = vmatprep.mubr.msk.bf16.mxu1 %vm1844_vm0, %v1843_v1  ;;  %v2060_v7 = vld [vmem:[#allocation6 + $0x48] ss:$12 sps:$4 sm:$0xff]   ;;  %v2065_v8 = vld [vmem:[#allocation6 + $0x38] ss:$12 sps:$4 sm:$0xff]   ;;  %v2068_v9 = vld [vmem:[#allocation6 + $0x60] ss:$12 sps:$4 sm:$0xff]  }
  0x66   : > { %1306 = vmatpush3.bf16.msra.mxu0 %v2039_v2  ;;  %1326 = vmatpush3.bf16.msra.mxu1 %v2054_v5  ;;  %v2073_v10 = vld [vmem:[#allocation6 + $0x50] ss:$12 sps:$4 sm:$0xff]   ;;  %v2076_v11 = vld [vmem:[#allocation6 + $0x78] ss:$12 sps:$4 sm:$0xff]   ;;  %v2081_v12 = vld [vmem:[#allocation6 + $0x68] ss:$12 sps:$4 sm:$0xff]  }
  0x67   : > { %1307 = vmatprep.subr.bf16.mxu0 %v1843_v1  ;;  %1327 = vmatprep.subr.bf16.mxu1 %v1843_v1  ;;  %v2084_v13 = vld [vmem:[#allocation6 + $0x90] ss:$12 sps:$4 sm:$0xff]   ;;  %v2089_v14 = vld [vmem:[#allocation6 + $0x80] ss:$12 sps:$4 sm:$0xff]   ;;  %v2092_v15 = vld [vmem:[#allocation6 + $0xa8] ss:$12 sps:$4 sm:$0xff]  }
  0x68   : > { %v2094_v16 = vld [vmem:[#allocation2] sm:$0xff]  ;;  %v2104_v19 = vld [vmem:[#allocation6 + $0x4] ss:$12 sps:$4 sm:$0xff]   ;;  %v2120_v22 = vld [vmem:[#allocation6 + $0x34] ss:$12 sps:$4 sm:$0xff]   ;;  %s1196_s11 = sshll.u32 %s1828_s15, 9 }
  0x69   : > { %v292_v17 = vpack.c.bf16 %v2094_v16, %v2094_v16  ;;  %v2101_v18 = vld [vmem:[#allocation6 + $0x98] ss:$12 sps:$4 sm:$0xff]   ;;  %v2109_v20 = vld [vmem:[#allocation6 + $0xb0] ss:$12 sps:$4 sm:$0xff]   ;;  %v2146_v26 = vld [vmem:[#allocation6 + $0x94] ss:$12 sps:$4 sm:$0xff]   ;;  %s2350_s19 = scalar_lea.hbm %s2405_s3, %s1196_s11 }
  0x6a   : > { %1308 = vmatpush3.bf16.msra.mxu0 %v2047_v3  ;;  %1328 = vmatpush3.bf16.msra.mxu1 %v2057_v6  ;;  %v2112_v21 = vld [vmem:[#allocation6 + $0x1c] ss:$12 sps:$4 sm:$0xff]   ;;  %v2128_v23 = vld [vmem:[#allocation6 + $0x4c] ss:$12 sps:$4 sm:$0xff]   ;;  %v2134_v24 = vld [vmem:[#allocation6 + $0x64] ss:$12 sps:$4 sm:$0xff]  }
  0x6b   : > { %1309 = vmatprep.subr.bf16.mxu0 %v1843_v1  ;;  %1329 = vmatprep.subr.bf16.mxu1 %v1843_v1  ;;  %v2140_v25 = vld [vmem:[#allocation6 + $0x7c] ss:$12 sps:$4 sm:$0xff]   ;;  %v2152_v27 = vld [vmem:[#allocation6 + $0xac] ss:$12 sps:$4 sm:$0xff]   ;;  %v287_v28 = vld [vmem:[%s2024_s9] sm:$0xff]  ;;  %s1041_s7 = sshll.u32 %s2035_s10, 4  ;;  %s2352_s7 = int_to_ptr.vmem [resolvable:$true] %s1041_s7 }
  0x6c   : > { %v289_v29 = vunpack.c.l.bf16 %v287_v28  ;;  %v2186_v42 = vld [vmem:[%s2404_s2] ss:$0 sm:$0xff]  ;;  %v290_v46 = vunpack.c.h.bf16 %v287_v28  ;;  %v1176_v0 = vld [vmem:[%s2024_s9 + $0xc] sm:$0xff]  ;;  %s1027_s30 = scalar_lea.sflag [#allocation5], %s2020_s25  ;;  %s1750_s21 = scalar_lea.vmem %s2352_s7, 512 }
  0x6d   : > { %v2190_v51 = vld [vmem:[%s2024_s9 + $0x8] ss:$12 sps:$4 sm:$0xff]   ;;  %p1751_p6 = scmp.ne.s32.totalorder %s2352_s7, %s1750_s21  ;;  %s1845_s15 = smov [#allocation8]  }
  0x6e   : > { %1310 = vmatpush3.bf16.msra.mxu0 %v2051_v4  ;;  %1330 = vmatpush3.bf16.msra.mxu1 %v2065_v8  ;;  %v291_v54 = vunpack.c.l.bf16 %v2190_v51  ;;  %s1754_s27 = sshll.u32 %s1845_s15, 4  ;;  %s1755_s27 = int_to_ptr.vmem [resolvable:$false] %s1754_s27 }
  0x6f   : > { %1311 = vmatprep.subr.bf16.mxu0 %v1843_v1  ;;  %1331 = vmatprep.subr.bf16.mxu1 %v1843_v1  ;;  %p1752_p8 = pnand %p1751_p6, %p1963_p10  ;;  %s1756_s4 = scalar_lea.vmem %s1755_s27, 1024 }
  0x70   : > { %p1757_p13 = scmp.lt.s32.totalorder %s2352_s7, %s1755_s27  ;;  %p1758_p0 = scmp.lt.s32.totalorder %s1756_s4, %s1750_s21 }
  0x71   : > { %p1753_p12 = pneg %p1752_p8 }
  0x72   : > { %1312 = vmatpush3.bf16.msra.mxu0 %v2060_v7  ;;  %1332 = vmatpush3.bf16.msra.mxu1 %v2073_v10  ;;  %p1759_p5 = por %p1758_p0, %p1757_p13 }
  0x73   : > { %1313 = vmatprep.subr.bf16.mxu0 %v1843_v1  ;;  %1333 = vmatprep.subr.bf16.mxu1 %v1843_v1 }
  0x74   : > { %p1760_p9 = pnand %p1759_p5, %p1753_p12 }
  0x76   : > { %1314 = vmatpush3.bf16.msra.mxu0 %v2068_v9  ;;  %1334 = vmatpush3.bf16.msra.mxu1 %v2081_v12 }
  0x77   : > { %1315 = vmatprep.subr.bf16.mxu0 %v1843_v1  ;;  %1335 = vmatprep.subr.bf16.mxu1 %v1843_v1 }
  0x7a   : > { %1316 = vmatpush3.bf16.msra.mxu0 %v2076_v11  ;;  %1336 = vmatpush3.bf16.msra.mxu1 %v2089_v14 }
  0x7b   : > { %1317 = vmatprep.subr.bf16.mxu0 %v1843_v1  ;;  %1337 = vmatprep.subr.bf16.mxu1 %v1843_v1 }
  0x7e   : > { %1318 = vmatpush3.bf16.msra.mxu0 %v2084_v13  ;;  %1338 = vmatpush3.bf16.msra.mxu1 %v2101_v18 }
  0x7f   : > { %1319 = vmatprep.subr.bf16.mxu0 %v1843_v1  ;;  %1339 = vmatprep.subr.bf16.mxu1 %v1843_v1 }
  0x82   : > { %1320 = vmatpush3.bf16.msra.mxu0 %v2092_v15  ;;  %1340 = vmatpush3.bf16.msra.mxu1 %v2109_v20 }
  0x83   : > { %1345 = vmatprep.subr.bf16.mxu0 %v1843_v1  ;;  %1365 = vmatprep.subr.bf16.mxu1 %v1843_v1 }
  0x85   : > { %1322 = vmatmul.mubr.bf16.vlgmr.msra.gmra.mrb[0].mxu0 %v292_v17  ;;  %1342 = vmatmul.mubr.bf16.vlgmr.msra.gmra.mrb[0].mxu1 %v292_v17 }
  0x86   : > { %1346 = vmatpush3.bf16.msra.mxu0 %v2104_v19  ;;  %1361 = vmatprep.mubr.msk.bf16.mxu0 %vm1844_vm0, %v1843_v1 }
  0x87   : > { %1347 = vmatprep.subr.bf16.mxu0 %v1843_v1  ;;  %1366 = vmatpush3.bf16.msra.mxu1 %v2039_v2 }
  0x88   : > { %1381 = vmatprep.mubr.msk.bf16.mxu1 %vm1844_vm0, %v1843_v1  ;;  %1367 = vmatprep.subr.bf16.mxu1 %v1843_v1 }
  0x8a   : > { %1348 = vmatpush3.bf16.msra.mxu0 %v2112_v21 }
  0x8b   : > { %1349 = vmatprep.subr.bf16.mxu0 %v1843_v1  ;;  %1368 = vmatpush3.bf16.msra.mxu1 %v2047_v3 }
  0x8c   : > { %1369 = vmatprep.subr.bf16.mxu1 %v1843_v1 }
  0x8e   : > { %1350 = vmatpush3.bf16.msra.mxu0 %v2120_v22 }
  0x8f   : > { %1351 = vmatprep.subr.bf16.mxu0 %v1843_v1  ;;  %1370 = vmatpush3.bf16.msra.mxu1 %v2051_v4 }
  0x90   : > { %1371 = vmatprep.subr.bf16.mxu1 %v1843_v1 }
  0x92   : > { %1352 = vmatpush3.bf16.msra.mxu0 %v2128_v23 }
  0x93   : > { %1353 = vmatprep.subr.bf16.mxu0 %v1843_v1  ;;  %1372 = vmatpush3.bf16.msra.mxu1 %v2060_v7 }
  0x94   : > { %1373 = vmatprep.subr.bf16.mxu1 %v1843_v1 }
  0x96   : > { %1354 = vmatpush3.bf16.msra.mxu0 %v2134_v24 }
  0x97   : > { %1355 = vmatprep.subr.bf16.mxu0 %v1843_v1  ;;  %1374 = vmatpush3.bf16.msra.mxu1 %v2068_v9 }
  0x98   : > { %1375 = vmatprep.subr.bf16.mxu1 %v1843_v1 }
  0x9a   : > { %1356 = vmatpush3.bf16.msra.mxu0 %v2140_v25 }
  0x9b   : > { %1357 = vmatprep.subr.bf16.mxu0 %v1843_v1  ;;  %1376 = vmatpush3.bf16.msra.mxu1 %v2076_v11 }
  0x9c   : > { %1377 = vmatprep.subr.bf16.mxu1 %v1843_v1 }
  0x9e   : > { %1358 = vmatpush3.bf16.msra.mxu0 %v2146_v26 }
  0x9f   : > { %1359 = vmatprep.subr.bf16.mxu0 %v1843_v1  ;;  %1378 = vmatpush3.bf16.msra.mxu1 %v2084_v13 }
  0xa0   : > { %1379 = vmatprep.subr.bf16.mxu1 %v1843_v1 }
  0xa2   : > { %1360 = vmatpush3.bf16.msra.mxu0 %v2152_v27 }
  0xa3   : > { %1385 = vmatprep.subr.bf16.mxu0 %v1843_v1  ;;  %1380 = vmatpush3.bf16.msra.mxu1 %v2092_v15 }
  0xa4   : > { %1405 = vmatprep.subr.bf16.mxu1 %v1843_v1 }
  0xa5   : > { %1362 = vmatmul.mubr.bf16.vlgmr.msra.gmra.mrb[4].mxu0 %v292_v17 }
  0xa6   : > { %1386 = vmatpush3.bf16.msra.mxu0 %v2054_v5  ;;  %1401 = vmatprep.mubr.msk.bf16.mxu0 %vm1844_vm0, %v1843_v1 }
  0xa7   : > { %1387 = vmatprep.subr.bf16.mxu0 %v1843_v1 }
  0xaa   : > { %1388 = vmatpush3.bf16.msra.mxu0 %v2057_v6 }
  0xab   : > { %1389 = vmatprep.subr.bf16.mxu0 %v1843_v1 }
  0xae   : > { %1390 = vmatpush3.bf16.msra.mxu0 %v2065_v8 }
  0xaf   : > { %1391 = vmatprep.subr.bf16.mxu0 %v1843_v1 }
  0xb2   : > { %1392 = vmatpush3.bf16.msra.mxu0 %v2073_v10 }
  0xb3   : > { %1393 = vmatprep.subr.bf16.mxu0 %v1843_v1 }
  0xb6   : > { %1394 = vmatpush3.bf16.msra.mxu0 %v2081_v12 }
  0xb7   : > { %1395 = vmatprep.subr.bf16.mxu0 %v1843_v1 }
  0xba   : > { %1396 = vmatpush3.bf16.msra.mxu0 %v2089_v14 }
  0xbb   : > { %1397 = vmatprep.subr.bf16.mxu0 %v1843_v1 }
  0xbe   : > { %1398 = vmatpush3.bf16.msra.mxu0 %v2101_v18 }
  0xbf   : > { %1399 = vmatprep.subr.bf16.mxu0 %v1843_v1 }
  0xc2   : > { %1400 = vmatpush3.bf16.msra.mxu0 %v2109_v20 }
  0xc3   : > { %1425 = vmatprep.subr.bf16.mxu0 %v1843_v1 }
 0x158   : > { %v375_v30 = vpop.f32.mrb[0].mxu0  ;;  %v470_v36 = vpop.f32.mrb[0].mxu1 }
 0x159   : > { %v381_v31 = vadd.f32 %v375_v30, %v289_v29  ;;  %v1323_v32 = vpop.f32.mrb[1].mxu0  ;;  %v1343_v37 = vpop.f32.mrb[1].mxu1  ;;  %v471_v43 = vadd.f32 %v2186_v42, %v470_v36 }
 0x15a   : > { %v378_v33 = vpop.f32.mrb[2].mxu0  ;;  %v473_v38 = vpop.f32.mrb[2].mxu1 }
 0x15b   : > { %v1158_v34 = vmul.f32 -1.442695, %v381_v31  ;;  %v1324_v35 = vpop.f32.mrb[3].mxu0  ;;  %v1344_v39 = vpop.f32.mrb[3].mxu1 }
 0x15d   : > { %1652 = vpow2.f32 %v1158_v34 }
 0x167   : > { %v1653_v40 = vpop.eup %1652 }
 0x168   : > { %v385_v41 = vadd.f32 1.0, %v1653_v40 }
 0x16a   : > { %1654 = vrcp.f32 %v385_v41 }
 0x174   : > { %v1655_v44 = vpop.eup %1654 }
 0x175   : > { %v476_v45 = vmul.f32 %v1655_v44, %v471_v43  ;;  %v582_v43 = vunpack.c.h.bf16 %v1176_v0 }
 0x177   : > { %v477_v55 = vadd.f32 %v476_v45, %v291_v54 }
 0x178   : > { %v561_v47 = vpop.f32.mrb[4].mxu0 }
 0x179   : > { %v567_v48 = vadd.f32 %v561_v47, %v290_v46  ;;  %v1363_v49 = vpop.f32.mrb[5].mxu0 }
 0x17a   : > { %v564_v50 = vpop.f32.mrb[6].mxu0 }
 0x17b   : > { %v1175_v52 = vmul.f32 -1.442695, %v567_v48  ;;  %v1364_v53 = vpop.f32.mrb[7].mxu0  ;;  %v583_v50 = vunpack.c.h.bf16 %v2190_v51 }
 0x17d   : > { %1656 = vpow2.f32 %v1175_v52 }
 0x17e   : > { %1658 = vtanh.f32 %v477_v55 }
 0x187   : > { %v1657_v56 = vpop.eup %1656 }
 0x188   : > { %v571_v57 = vadd.f32 1.0, %v1657_v56  ;;  %v1659_v58 = vpop.eup %1658 }
 0x189   : > { %v574_v59 = vsub.f32 %v2094_v16, %v1659_v58  ;;  %v581_v16 = vunpack.c.l.bf16 %v1176_v0 }
 0x18a   : > { %1660 = vrcp.f32 %v571_v57 }
 0x194   : > { %v1661_v60 = vpop.eup %1660 }
 0x195   : > { %v575_v61 = vmul.f32 %v1661_v60, %v574_v59 }
 0x197   : > { %v2194_v62 = vadd.f32 %v1659_v58, %v575_v61 }
 0x199   : > { %577 = vst [vmem:[%s2035_s10] sm:$0xff] %v2194_v62  ;;  %v584_v63 = vpack.c.bf16 %v2194_v62, %v2194_v62 }
 0x19b   : > { %1382 = vmatmul.mubr.bf16.vlgmr.msra.gmra.mrb[4].mxu1 %v584_v63  ;;  %1402 = vmatmul.mubr.bf16.vlgmr.msra.gmra.mrb[8].mxu0 %v584_v63 }
 0x19c   : > { %1406 = vmatpush3.bf16.msra.mxu1 %v2104_v19  ;;  %1421 = vmatprep.mubr.msk.bf16.mxu1 %vm1844_vm0, %v1843_v1 }
 0x19d   : > { %1407 = vmatprep.subr.bf16.mxu1 %v1843_v1  ;;  %1426 = vmatpush3.bf16.msra.mxu0 %v2039_v2 }
 0x19e   : > { %1427 = vmatprep.subr.bf16.mxu0 %v1843_v1  ;;  %1441 = vmatprep.mubr.msk.bf16.mxu0 %vm1844_vm0, %v1843_v1 }
 0x1a0   : > { %1408 = vmatpush3.bf16.msra.mxu1 %v2112_v21 }
 0x1a1   : > { %1409 = vmatprep.subr.bf16.mxu1 %v1843_v1  ;;  %1428 = vmatpush3.bf16.msra.mxu0 %v2047_v3 }
 0x1a2   : > { %1429 = vmatprep.subr.bf16.mxu0 %v1843_v1 }
 0x1a4   : > { %1410 = vmatpush3.bf16.msra.mxu1 %v2120_v22 }
 0x1a5   : > { %1411 = vmatprep.subr.bf16.mxu1 %v1843_v1  ;;  %1430 = vmatpush3.bf16.msra.mxu0 %v2051_v4 }
 0x1a6   : > { %1431 = vmatprep.subr.bf16.mxu0 %v1843_v1 }
 0x1a8   : > { %1412 = vmatpush3.bf16.msra.mxu1 %v2128_v23 }
 0x1a9   : > { %1413 = vmatprep.subr.bf16.mxu1 %v1843_v1  ;;  %1432 = vmatpush3.bf16.msra.mxu0 %v2060_v7 }
 0x1aa   : > { %1433 = vmatprep.subr.bf16.mxu0 %v1843_v1 }
 0x1ac   : > { %1414 = vmatpush3.bf16.msra.mxu1 %v2134_v24 }
 0x1ad   : > { %1415 = vmatprep.subr.bf16.mxu1 %v1843_v1  ;;  %1434 = vmatpush3.bf16.msra.mxu0 %v2068_v9 }
 0x1ae   : > { %1435 = vmatprep.subr.bf16.mxu0 %v1843_v1 }
 0x1b0   : > { %1416 = vmatpush3.bf16.msra.mxu1 %v2140_v25 }
 0x1b1   : > { %1417 = vmatprep.subr.bf16.mxu1 %v1843_v1  ;;  %1436 = vmatpush3.bf16.msra.mxu0 %v2076_v11 }
 0x1b2   : > { %1437 = vmatprep.subr.bf16.mxu0 %v1843_v1 }
 0x1b4   : > { %1418 = vmatpush3.bf16.msra.mxu1 %v2146_v26 }
 0x1b5   : > { %1419 = vmatprep.subr.bf16.mxu1 %v1843_v1  ;;  %1438 = vmatpush3.bf16.msra.mxu0 %v2084_v13 }
 0x1b6   : > { %1439 = vmatprep.subr.bf16.mxu0 %v1843_v1 }
 0x1b8   : > { %1420 = vmatpush3.bf16.msra.mxu1 %v2152_v27 }
 0x1b9   : > { %1445 = vmatprep.subr.bf16.mxu1 %v1843_v1  ;;  %1440 = vmatpush3.bf16.msra.mxu0 %v2092_v15 }
 0x1ba   : > { %1465 = vmatprep.subr.bf16.mxu0 %v1843_v1 }
 0x1bb   : > { %1422 = vmatmul.mubr.bf16.vlgmr.msra.gmra.mrb[8].mxu1 %v584_v63 }
 0x1bc   : > { %1446 = vmatpush3.bf16.msra.mxu1 %v2054_v5  ;;  %1461 = vmatprep.mubr.msk.bf16.mxu1 %vm1844_vm0, %v1843_v1 }
 0x1bd   : > { %1447 = vmatprep.subr.bf16.mxu1 %v1843_v1 }
 0x1c0   : > { %1448 = vmatpush3.bf16.msra.mxu1 %v2057_v6 }
 0x1c1   : > { %1449 = vmatprep.subr.bf16.mxu1 %v1843_v1 }
 0x1c4   : > { %1450 = vmatpush3.bf16.msra.mxu1 %v2065_v8 }
 0x1c5   : > { %1451 = vmatprep.subr.bf16.mxu1 %v1843_v1 }
 0x1c8   : > { %1452 = vmatpush3.bf16.msra.mxu1 %v2073_v10 }
 0x1c9   : > { %1453 = vmatprep.subr.bf16.mxu1 %v1843_v1 }
 0x1cc   : > { %1454 = vmatpush3.bf16.msra.mxu1 %v2081_v12 }
 0x1cd   : > { %1455 = vmatprep.subr.bf16.mxu1 %v1843_v1 }
 0x1d0   : > { %1456 = vmatpush3.bf16.msra.mxu1 %v2089_v14 }
 0x1d1   : > { %1457 = vmatprep.subr.bf16.mxu1 %v1843_v1 }
 0x1d4   : > { %1458 = vmatpush3.bf16.msra.mxu1 %v2101_v18 }
 0x1d5   : > { %1459 = vmatprep.subr.bf16.mxu1 %v1843_v1 }
 0x1d8   : > { %1460 = vmatpush3.bf16.msra.mxu1 %v2109_v20 }
 0x1d9   : > { %1485 = vmatprep.subr.bf16.mxu1 %v1843_v1 }
 0x26e   : > { %v619_v17 = vpop.f32.mrb[4].mxu1  ;;  %v666_v28 = vpop.f32.mrb[8].mxu0 }
 0x26f   : > { %v625_v29 = vadd.f32 %v619_v17, %v581_v16  ;;  %v1383_v30 = vpop.f32.mrb[5].mxu1  ;;  %v1403_v31 = vpop.f32.mrb[9].mxu0  ;;  %v667_v39 = vadd.f32 %v2186_v42, %v666_v28  ;;  %v2320_v17 = vld [vmem:[%s2024_s9 + $0x20] ss:$12 sps:$4 sm:$0xff]  }
 0x270   : > { %v622_v32 = vpop.f32.mrb[6].mxu1  ;;  %v669_v33 = vpop.f32.mrb[10].mxu0  ;;  %v732_v30 = vunpack.c.l.bf16 %v2320_v17 }
 0x271   : > { %v1178_v34 = vmul.f32 -1.442695, %v625_v29  ;;  %v1384_v35 = vpop.f32.mrb[7].mxu1  ;;  %v1404_v36 = vpop.f32.mrb[11].mxu0 }
 0x273   : > { %1662 = vpow2.f32 %v1178_v34 }
 0x27d   : > { %v1663_v37 = vpop.eup %1662 }
 0x27e   : > { %v629_v38 = vadd.f32 1.0, %v1663_v37 }
 0x280   : > { %1664 = vrcp.f32 %v629_v38 }
 0x28a   : > { %v1665_v40 = vpop.eup %1664 }
 0x28b   : > { %v672_v41 = vmul.f32 %v1665_v40, %v667_v39 }
 0x28d   : > { %v673_v52 = vadd.f32 %v672_v41, %v583_v50 }
 0x28e   : > { %v709_v44 = vpop.f32.mrb[8].mxu1 }
 0x28f   : > { %v715_v45 = vadd.f32 %v709_v44, %v582_v43  ;;  %v1423_v46 = vpop.f32.mrb[9].mxu1 }
 0x290   : > { %v712_v47 = vpop.f32.mrb[10].mxu1 }
 0x291   : > { %v1179_v48 = vmul.f32 -1.442695, %v715_v45  ;;  %v1424_v49 = vpop.f32.mrb[11].mxu1 }
 0x293   : > { %1666 = vpow2.f32 %v1179_v48 }
 0x294   : > { %1668 = vtanh.f32 %v673_v52 }
 0x29d   : > { %v1667_v53 = vpop.eup %1666 }
 0x29e   : > { %v719_v54 = vadd.f32 1.0, %v1667_v53  ;;  %v1669_v55 = vpop.eup %1668 }
 0x29f   : > { %v722_v56 = vsub.f32 %v2194_v62, %v1669_v55 }
 0x2a0   : > { %1670 = vrcp.f32 %v719_v54 }
 0x2aa   : > { %v1671_v57 = vpop.eup %1670 }
 0x2ab   : > { %v723_v58 = vmul.f32 %v1671_v57, %v722_v56  ;;  %v881_v57 = vunpack.c.h.bf16 %v2320_v17 }
 0x2ad   : > { %v2258_v59 = vadd.f32 %v1669_v55, %v723_v58 }
 0x2af   : > { %1180 = vst [vmem:[%s2035_s10 + $0x8] sm:$0xff] %v2258_v59  ;;  %v733_v60 = vpack.c.bf16 %v2258_v59, %v2258_v59 }
 0x2b1   : > { %1442 = vmatmul.mubr.bf16.vlgmr.msra.gmra.mrb[12].mxu0 %v733_v60  ;;  %1462 = vmatmul.mubr.bf16.vlgmr.msra.gmra.mrb[12].mxu1 %v733_v60 }
 0x2b2   : > { %1466 = vmatpush3.bf16.msra.mxu0 %v2104_v19  ;;  %1481 = vmatprep.mubr.msk.bf16.mxu0 %vm1844_vm0, %v1843_v1 }
 0x2b3   : > { %1467 = vmatprep.subr.bf16.mxu0 %v1843_v1  ;;  %1486 = vmatpush3.bf16.msra.mxu1 %v2039_v2  ;;  %v1181_v2 = vld [vmem:[%s2024_s9 + $0x18] sm:$0xff] }
 0x2b4   : > { %1487 = vmatprep.subr.bf16.mxu1 %v1843_v1  ;;  %1501 = vmatprep.mubr.msk.bf16.mxu1 %vm1844_vm0, %v1843_v1  ;;  %v731_v61 = vunpack.c.h.bf16 %v1181_v2 }
 0x2b6   : > { %1468 = vmatpush3.bf16.msra.mxu0 %v2112_v21 }
 0x2b7   : > { %1469 = vmatprep.subr.bf16.mxu0 %v1843_v1  ;;  %1488 = vmatpush3.bf16.msra.mxu1 %v2047_v3  ;;  %v730_v3 = vunpack.c.l.bf16 %v1181_v2 }
 0x2b8   : > { %1489 = vmatprep.subr.bf16.mxu1 %v1843_v1 }
 0x2ba   : > { %1470 = vmatpush3.bf16.msra.mxu0 %v2120_v22 }
 0x2bb   : > { %1471 = vmatprep.subr.bf16.mxu0 %v1843_v1  ;;  %1490 = vmatpush3.bf16.msra.mxu1 %v2051_v4 }
 0x2bc   : > { %1491 = vmatprep.subr.bf16.mxu1 %v1843_v1 }
 0x2be   : > { %1472 = vmatpush3.bf16.msra.mxu0 %v2128_v23 }
 0x2bf   : > { %1473 = vmatprep.subr.bf16.mxu0 %v1843_v1  ;;  %1492 = vmatpush3.bf16.msra.mxu1 %v2060_v7 }
 0x2c0   : > { %1493 = vmatprep.subr.bf16.mxu1 %v1843_v1 }
 0x2c2   : > { %1474 = vmatpush3.bf16.msra.mxu0 %v2134_v24 }
 0x2c3   : > { %1475 = vmatprep.subr.bf16.mxu0 %v1843_v1  ;;  %1494 = vmatpush3.bf16.msra.mxu1 %v2068_v9 }
 0x2c4   : > { %1495 = vmatprep.subr.bf16.mxu1 %v1843_v1 }
 0x2c6   : > { %1476 = vmatpush3.bf16.msra.mxu0 %v2140_v25 }
 0x2c7   : > { %1477 = vmatprep.subr.bf16.mxu0 %v1843_v1  ;;  %1496 = vmatpush3.bf16.msra.mxu1 %v2076_v11 }
 0x2c8   : > { %1497 = vmatprep.subr.bf16.mxu1 %v1843_v1 }
 0x2ca   : > { %1478 = vmatpush3.bf16.msra.mxu0 %v2146_v26 }
 0x2cb   : > { %1479 = vmatprep.subr.bf16.mxu0 %v1843_v1  ;;  %1498 = vmatpush3.bf16.msra.mxu1 %v2084_v13 }
 0x2cc   : > { %1499 = vmatprep.subr.bf16.mxu1 %v1843_v1 }
 0x2ce   : > { %1480 = vmatpush3.bf16.msra.mxu0 %v2152_v27 }
 0x2cf   : > { %1505 = vmatprep.subr.bf16.mxu0 %v1843_v1  ;;  %1500 = vmatpush3.bf16.msra.mxu1 %v2092_v15 }
 0x2d0   : > { %1525 = vmatprep.subr.bf16.mxu1 %v1843_v1 }
 0x2d1   : > { %1482 = vmatmul.mubr.bf16.vlgmr.msra.gmra.mrb[16].mxu0 %v733_v60 }
 0x2d2   : > { %1506 = vmatpush3.bf16.msra.mxu0 %v2054_v5  ;;  %1521 = vmatprep.mubr.msk.bf16.mxu0 %vm1844_vm0, %v1843_v1 }
 0x2d3   : > { %1507 = vmatprep.subr.bf16.mxu0 %v1843_v1 }
 0x2d6   : > { %1508 = vmatpush3.bf16.msra.mxu0 %v2057_v6 }
 0x2d7   : > { %1509 = vmatprep.subr.bf16.mxu0 %v1843_v1 }
 0x2da   : > { %1510 = vmatpush3.bf16.msra.mxu0 %v2065_v8 }
 0x2db   : > { %1511 = vmatprep.subr.bf16.mxu0 %v1843_v1 }
 0x2de   : > { %1512 = vmatpush3.bf16.msra.mxu0 %v2073_v10 }
 0x2df   : > { %1513 = vmatprep.subr.bf16.mxu0 %v1843_v1 }
 0x2e2   : > { %1514 = vmatpush3.bf16.msra.mxu0 %v2081_v12 }
 0x2e3   : > { %1515 = vmatprep.subr.bf16.mxu0 %v1843_v1 }
 0x2e6   : > { %1516 = vmatpush3.bf16.msra.mxu0 %v2089_v14 }
 0x2e7   : > { %1517 = vmatprep.subr.bf16.mxu0 %v1843_v1 }
 0x2ea   : > { %1518 = vmatpush3.bf16.msra.mxu0 %v2101_v18 }
 0x2eb   : > { %1519 = vmatprep.subr.bf16.mxu0 %v1843_v1 }
 0x2ee   : > { %1520 = vmatpush3.bf16.msra.mxu0 %v2109_v20 }
 0x384   : > { %v768_v4 = vpop.f32.mrb[12].mxu0  ;;  %v815_v5 = vpop.f32.mrb[12].mxu1 }
 0x385   : > { %v774_v6 = vadd.f32 %v768_v4, %v730_v3  ;;  %v1443_v7 = vpop.f32.mrb[13].mxu0  ;;  %v1463_v8 = vpop.f32.mrb[13].mxu1  ;;  %v816_v18 = vadd.f32 %v2186_v42, %v815_v5 }
 0x386   : > { %v771_v9 = vpop.f32.mrb[14].mxu0  ;;  %v818_v10 = vpop.f32.mrb[14].mxu1 }
 0x387   : > { %v1183_v11 = vmul.f32 -1.442695, %v774_v6  ;;  %v1444_v12 = vpop.f32.mrb[15].mxu0  ;;  %v1464_v13 = vpop.f32.mrb[15].mxu1 }
 0x389   : > { %1672 = vpow2.f32 %v1183_v11 }
 0x393   : > { %v1673_v14 = vpop.eup %1672 }
 0x394   : > { %v778_v15 = vadd.f32 1.0, %v1673_v14 }
 0x396   : > { %1674 = vrcp.f32 %v778_v15 }
 0x3a0   : > { %v1675_v20 = vpop.eup %1674 }
 0x3a1   : > { %v821_v51 = vmul.f32 %v1675_v20, %v816_v18 }
 0x3a3   : > { %v822_v31 = vadd.f32 %v821_v51, %v732_v30 }
 0x3a4   : > { %v858_v62 = vpop.f32.mrb[16].mxu0 }
 0x3a5   : > { %v864_v63 = vadd.f32 %v858_v62, %v731_v61  ;;  %v1483_v0 = vpop.f32.mrb[17].mxu0 }
 0x3a6   : > { %v861_v16 = vpop.f32.mrb[18].mxu0 }
 0x3a7   : > { %v1184_v28 = vmul.f32 -1.442695, %v864_v63  ;;  %v1484_v29 = vpop.f32.mrb[19].mxu0 }
 0x3a9   : > { %1676 = vpow2.f32 %v1184_v28 }
 0x3aa   : > { %1678 = vtanh.f32 %v822_v31 }
 0x3b3   : > { %v1677_v32 = vpop.eup %1676 }
 0x3b4   : > { %v868_v33 = vadd.f32 1.0, %v1677_v32  ;;  %v1679_v34 = vpop.eup %1678 }
 0x3b5   : > { %v871_v35 = vsub.f32 %v2258_v59, %v1679_v34 }
 0x3b6   : > { %1680 = vrcp.f32 %v868_v33 }
 0x3c0   : > { %v1681_v36 = vpop.eup %1680 }
 0x3c1   : > { %v872_v37 = vmul.f32 %v1681_v36, %v871_v35 }
 0x3c3   : > { %v873_v38 = vadd.f32 %v1679_v34, %v872_v37 }
 0x3c5   : > { %1185 = vst [vmem:[%s2035_s10 + $0x10] sm:$0xff] %v873_v38  ;;  %v882_v39 = vpack.c.bf16 %v873_v38, %v873_v38 }
 0x3c7   : > { %1502 = vmatmul.mubr.bf16.vlgmr.msra.gmra.mrb[16].mxu1 %v882_v39  ;;  %1522 = vmatmul.mubr.bf16.vlgmr.msra.gmra.mrb[20].mxu0 %v882_v39 }
 0x3c8   : > { %1526 = vmatpush3.bf16.msra.mxu1 %v2104_v19  ;;  %1541 = vmatprep.mubr.msk.bf16.mxu1 %vm1844_vm0, %v1843_v1  ;;  %v1186_v19 = vld [vmem:[%s2024_s9 + $0x24] sm:$0xff] }
 0x3c9   : > { %1527 = vmatprep.subr.bf16.mxu1 %v1843_v1  ;;  %v880_v49 = vunpack.c.h.bf16 %v1186_v19 }
 0x3cc   : > { %1528 = vmatpush3.bf16.msra.mxu1 %v2112_v21  ;;  %v879_v21 = vunpack.c.l.bf16 %v1186_v19 }
 0x3cd   : > { %1529 = vmatprep.subr.bf16.mxu1 %v1843_v1 }
 0x3d0   : > { %1530 = vmatpush3.bf16.msra.mxu1 %v2120_v22 }
 0x3d1   : > { %1531 = vmatprep.subr.bf16.mxu1 %v1843_v1 }
 0x3d4   : > { %1532 = vmatpush3.bf16.msra.mxu1 %v2128_v23 }
 0x3d5   : > { %1533 = vmatprep.subr.bf16.mxu1 %v1843_v1 }
 0x3d8   : > { %1534 = vmatpush3.bf16.msra.mxu1 %v2134_v24 }
 0x3d9   : > { %1535 = vmatprep.subr.bf16.mxu1 %v1843_v1 }
 0x3dc   : > { %1536 = vmatpush3.bf16.msra.mxu1 %v2140_v25 }
 0x3dd   : > { %1537 = vmatprep.subr.bf16.mxu1 %v1843_v1 }
 0x3e0   : > { %1538 = vmatpush3.bf16.msra.mxu1 %v2146_v26 }
 0x3e1   : > { %1539 = vmatprep.subr.bf16.mxu1 %v1843_v1 }
 0x3e4   : > { %1540 = vmatpush3.bf16.msra.mxu1 %v2152_v27 }
 0x3e7   : > { %1542 = vmatmul.mubr.bf16.vlgmr.msra.gmra.mrb[20].mxu1 %v882_v39 }
 0x49a   : > { %v917_v22 = vpop.f32.mrb[16].mxu1  ;;  %v964_v23 = vpop.f32.mrb[20].mxu0 }
 0x49b   : > { %v923_v40 = vadd.f32 %v917_v22, %v879_v21  ;;  %v1503_v41 = vpop.f32.mrb[17].mxu1  ;;  %v1523_v24 = vpop.f32.mrb[21].mxu0  ;;  %v965_v1 = vadd.f32 %v2186_v42, %v964_v23 }
 0x49c   : > { %v920_v43 = vpop.f32.mrb[18].mxu1  ;;  %v967_v44 = vpop.f32.mrb[22].mxu0 }
 0x49d   : > { %v1188_v45 = vmul.f32 -1.442695, %v923_v40  ;;  %v1504_v25 = vpop.f32.mrb[19].mxu1  ;;  %v1524_v46 = vpop.f32.mrb[23].mxu0 }
 0x49f   : > { %1682 = vpow2.f32 %v1188_v45 }
 0x4a9   : > { %v1683_v47 = vpop.eup %1682 }
 0x4aa   : > { %v927_v26 = vadd.f32 1.0, %v1683_v47 }
 0x4ac   : > { %1684 = vrcp.f32 %v927_v26 }
 0x4b6   : > { %v1685_v27 = vpop.eup %1684 }
 0x4b7   : > { %v970_v48 = vmul.f32 %v1685_v27, %v965_v1 }
 0x4b9   : > { %v971_v58 = vadd.f32 %v970_v48, %v881_v57 }
 0x4ba   : > { %v1007_v50 = vpop.f32.mrb[20].mxu1 }
 0x4bb   : > { %v1013_v52 = vadd.f32 %v1007_v50, %v880_v49  ;;  %v1543_v53 = vpop.f32.mrb[21].mxu1 }
 0x4bc   : > { %v1010_v54 = vpop.f32.mrb[22].mxu1 }
 0x4bd   : > { %v1189_v55 = vmul.f32 -1.442695, %v1013_v52  ;;  %v1544_v56 = vpop.f32.mrb[23].mxu1 }
 0x4bf   : > { %1686 = vpow2.f32 %v1189_v55 }
 0x4c0   : > { %1688 = vtanh.f32 %v971_v58 }
 0x4c9   : > { %v1687_v59 = vpop.eup %1686 }
 0x4ca   : > { %v1017_v42 = vadd.f32 1.0, %v1687_v59  ;;  %v1689_v60 = vpop.eup %1688 }
 0x4cb   : > { %v1020_v2 = vsub.f32 %v873_v38, %v1689_v60 }
 0x4cc   : > { %1690 = vrcp.f32 %v1017_v42 }
 0x4d6   : > { %v1691_v3 = vpop.eup %1690 }
 0x4d7   : > { %v1021_v4 = vmul.f32 %v1691_v3, %v1020_v2 }
 0x4d9   : > { %v1022_v5 = vadd.f32 %v1689_v60, %v1021_v4 }
 0x4db   : > { %1025 = vst [vmem:[#allocation2] sm:$0xff] %v1022_v5  ;;  %1190 = vst [vmem:[%s2035_s10 + $0x18] sm:$0xff] %v1022_v5 }
 0x4dc   : > { %1763 = shalt.err (!%p1760_p9)
}
 0x4dd   : > { %s1764_s26 = scalar_lea.hbm %s2350_s19, 512  ;;  %s1768_s24 = scalar_lea.hbm %s2405_s3, 1024 }
 0x4de   : > { %p1765_p1 = scmp.ne.s32.totalorder %s2350_s19, %s1764_s26  ;;  %p1769_p7 = scmp.lt.u32.totalorder %s2350_s19, %s2405_s3 }
 0x4df   : > { %p1770_p11 = scmp.lt.u32.totalorder %s1768_s24, %s1764_s26  ;;  %p1772_p6 = scmp.lt.u32.totalorder %s1764_s26, %s2350_s19 }
 0x4e0   : > { %p1766_p2 = pnand %p1765_p1, %p1963_p10 }
 0x4e1   : > { %p1771_p4 = por %p1770_p11, %p1769_p7 }
 0x4e2   : > { %p1767_p3 = pneg %p1766_p2 }
 0x4e3   : > { %p1773_p8 = por %p1772_p6, %p1771_p4 }
 0x4e5   : > { %p1774_p12 = pnand %p1773_p8, %p1767_p3 }
 0x4e7   : > { %1777 = shalt.err (!%p1774_p12)
}
 0x4e8   : > { %s1846_s22 = smov 128   ;;  %s1847_s11 = smov 8  }
 0x4e9   : > { %1554 = dma.vmem_to_hbm [thread:$0]  (%p1963_p10), %s2352_s7, 512, %s2350_s19, %s1027_s30, %s1846_s22, %s1846_s22, %s1847_s11  }
 0x4ea PF: > { %s1056_s8 = sand.u32 1, %s1816_s12   ;;  %p2422_p13 = scmp.ne.s32.totalorder %s2413_s23, 0 }
 0x4eb   : > { %p2423_p0 = scmp.ge.s32.totalorder %s1836_s17, 2  ;;  %s1057_s18 = scalar_lea.sflag [#allocation5], %s1056_s8 }
 0x4ed   : > { %p1565_p5 = pnand %p2423_p0, %p2422_p13 }
 0x4ef   : > { %1811 = dma.done.wait (!%p1565_p5), %s1057_s18, 512  }
 0x4f0   : > { %1813 = vsyncadd (!%p1565_p5), %s1057_s18, 4294966784  ;;  %s20_s17 = sadd.s32 1, %s1836_s17   ;;  %s2424_s12 = smov %s1820_s13 }
 0x4f1   : > { %p17_p9 = scmp.ge.s32.totalorder %s20_s17, 4   ;;  %s2425_s13 = smov %s1824_s14 }
 0x4f2   : > { %s2426_s14 = smov %s1972_s5  ;;  %s2427_s15 = smov %s1832_s16 }
 0x4f3   : > { %s2428_s16 = smov %s2430_s28  ;;  %19 = sbr.rel (!%p17_p9) target bundleno = 7 (0x7), region = 91 }
 0x4fa   :  { %1062 = vsyncpa [#allocation4], 1 }
 0x4fb   :  { %1064 = vsyncpa [#allocation4 + $0x1], 1 }
 0x4fc   :  { %1065 = vsyncpa [#allocation7], 1 }
 0x4fd   :  { %1066 = vsyncpa [#allocation5], 1 }
 0x4fe   :  { %1068 = vsyncpa [#allocation5 + $0x1], 1 }

</bundles_post_ra>
